<compile_context>
chip_gen: v5e
topology: v5e:2x2
jax: 0.10.0
libtpu: 0.0.40
codegen_flags: <defaults>
</compile_context>

<pallas_src>
import jax
import jax.numpy as jnp
from jax.experimental import pallas as pl
from jax.experimental.pallas import tpu as pltpu

# ------------------------- configuration (small shapes) ----------------------
B_SIZE       = 2          # sequences in the batch (len(data.y))
SEQ_SIZE     = 4          # frames per sequence
NUM_JOINTS   = 8          # joints (graph nodes) per frame
NUM_CHANNELS = 3          # xyz per joint
HIDDEN       = 16         # GCN hidden dim
CODEBOOK     = 128        # codebook size (lane-dense for the toy run)
COMMIT_W     = 0.25
LAMB_ENTROPY = 0.03
LAMB_NODE    = 0.001
LAMB_DIST    = 0.001
LAMB_SPEED   = 0.1
LAMB_ACC     = 0.1

M         = B_SIZE * SEQ_SIZE          # 8 frames
N         = M * NUM_JOINTS             # 64 graph nodes total
D         = HIDDEN * NUM_JOINTS        # 128 = quantized dim (lane-dense)
C_PAD     = HIDDEN                     # pad xyz 3 -> 16 so input frame is (M,128)
OUT_JOINT = 3 * NUM_JOINTS             # 24 real decoder columns (padded to 128)

_VMEM = pltpu.MemorySpace.VMEM


def _vspec():
    return pl.BlockSpec(memory_space=_VMEM)


# ------------------------------ fused Pallas kernel ---------------------------
def _vqgnn_kernel(x_ref,
                  wf1, bt1, wf2, bt2, wf3, bt3, wf4, bt4,
                  pool_ref,
                  w_lat, b_lat,
                  cbt_ref, cb_ref, c_sq_ref,
                  w_dec, b_dec, w_node, b_node,
                  z_ref, q_ref, onehot_ref, joints_ref):
    pool = pool_ref[...]                                   # (128,128) f32

    def gelu(x):
        # F.gelu(x, approximate='tanh')
        c = jnp.float32(0.7978845608028654)                # sqrt(2/pi)
        return 0.5 * x * (1.0 + jnp.tanh(c * (x + 0.044715 * x * x * x)))

    def gcn(h, w_ref, b_ref):
        # Folded GCN layer in frame-major layout:
        #   vec(Â_frame @ H @ W) = vec(H) @ kron(Â_frame, W)
        y = jnp.dot(h.astype(jnp.bfloat16), w_ref[...],
                    preferred_element_type=jnp.float32)
        return y + b_ref[...]

    def bn(h, eps=1e-5):
        # BatchNorm1d (training forward, gamma=1, beta=0) over all N nodes:
        # row-mean over frames, then joint-pool matmul for per-channel stats.
        mu = jnp.dot(jnp.mean(h, axis=0, keepdims=True), pool,
                     preferred_element_type=jnp.float32)
        cen = h - mu
        var = jnp.dot(jnp.mean(cen * cen, axis=0, keepdims=True), pool,
                      preferred_element_type=jnp.float32)
        return cen * jax.lax.rsqrt(var + eps)

    # ---- encoder: conv1..conv4, gelu, bn (dropout=0), early return at 4 ----
    h = bn(gelu(gcn(x_ref[...], wf1, bt1)))
    h = bn(gelu(gcn(h, wf2, bt2)))
    h = bn(gelu(gcn(h, wf3, bt3)))
    h = gelu(gcn(h, wf4, bt4))

    # ---- latent_layer ----
    z = jnp.dot(h.astype(jnp.bfloat16), w_lat[...],
                preferred_element_type=jnp.float32) + b_lat[...]
    z_ref[...] = z

    # ---- vq_first: nearest codebook entry by L2 ----
    # argmin_k ||z - c_k||^2 == argmin_k (||c_k||^2 - 2 z.c_k)  (||z||^2 per-row const)
    zc = jnp.dot(z.astype(jnp.bfloat16), cbt_ref[...],
                 preferred_element_type=jnp.float32)        # (M, K)
    d = c_sq_ref[...] - 2.0 * zc
    min_d = jnp.min(d, axis=-1, keepdims=True)
    iota = jax.lax.broadcasted_iota(jnp.int32, d.shape, 1)
    idx = jnp.min(jnp.where(d <= min_d, iota, d.shape[-1]),
                  axis=-1, keepdims=True)                   # argmin, ties -> lowest
    onehot = (iota == idx).astype(jnp.float32)
    onehot_ref[...] = onehot
    q = jnp.dot(onehot.astype(jnp.bfloat16), cb_ref[...],
                preferred_element_type=jnp.float32)         # codebook gather
    q_ref[...] = q
    # TODO(synk): straight-through estimator (custom_vjp dq->dz) needed if this
    # forward is ever differentiated for training.

    # ---- decode_graph: linear_decode1 + gelu -> decoder_node ----
    z2 = gelu(jnp.dot(q.astype(jnp.bfloat16), w_dec[...],
                      preferred_element_type=jnp.float32) + b_dec[...])
    joints_ref[...] = jnp.dot(z2.astype(jnp.bfloat16), w_node[...],
                              preferred_element_type=jnp.float32) + b_node[...]
    # TODO(synk): decoder_edge logits are computed then discarded in the
    # reference forward(); omitted here.


def vqgnn_pallas(x_frame, p):
    return pl.pallas_call(
        _vqgnn_kernel,
        out_shape=(
            jax.ShapeDtypeStruct((M, D), jnp.float32),          # z (pre-quant)
            jax.ShapeDtypeStruct((M, D), jnp.float32),          # quantized
            jax.ShapeDtypeStruct((M, CODEBOOK), jnp.float32),   # one-hot codes
            jax.ShapeDtypeStruct((M, D), jnp.float32),          # joints, 128-padded
        ),
        in_specs=[_vspec()] * 19,
        out_specs=(_vspec(), _vspec(), _vspec(), _vspec()),
    )(x_frame,
      p["wf1"], p["bt1"], p["wf2"], p["bt2"], p["wf3"], p["bt3"],
      p["wf4"], p["bt4"], p["pool"],
      p["w_lat"], p["b_lat"],
      p["cbt"], p["cb"], p["c_sq"],
      p["w_dec1"], p["b_dec1"], p["w_node"], p["b_node"])


# ------------------------------ param / graph setup ----------------------------
def init_params(key):
    keys = jax.random.split(key, 10)

    def lin(k, fin, fout):
        s = 1.0 / jnp.sqrt(jnp.float32(fin))
        return jax.random.uniform(k, (fin, fout), jnp.float32, -s, s)

    # Per-frame skeleton (chain over joints, both directions) and its GCN
    # normalization  Â = D^{-1/2}(A + I)D^{-1/2}.  The batched-graph adjacency
    # is block-diagonal with this identical block, so it is folded into the
    # layer weights instead of being materialized as an (N,N) input.
    src = jnp.arange(NUM_JOINTS - 1, dtype=jnp.int32)
    dst = src + 1
    skel = jnp.stack([jnp.concatenate([src, dst]),
                      jnp.concatenate([dst, src])])              # (2, 2*(J-1))
    a = jnp.zeros((NUM_JOINTS, NUM_JOINTS), jnp.float32)
    a = a.at[skel[0], skel[1]].set(1.0)
    a_hat = a + jnp.eye(NUM_JOINTS, dtype=jnp.float32)
    d_inv = jax.lax.rsqrt(jnp.sum(a_hat, axis=1))
    adj_norm = d_inv[:, None] * a_hat * d_inv[None, :]           # (J,J), symmetric

    p = {"skel": skel}

    w1 = lin(keys[0], NUM_CHANNELS, HIDDEN)
    w1_pad = jnp.pad(w1, ((0, C_PAD - NUM_CHANNELS), (0, 0)))    # zero rows for pad
    layer_ws = [w1_pad,
                lin(keys[1], HIDDEN, HIDDEN),
                lin(keys[2], HIDDEN, HIDDEN),
                lin(keys[3], HIDDEN, HIDDEN)]
    for l, w in enumerate(layer_ws, start=1):
        p[f"wf{l}"] = jnp.kron(adj_norm, w).astype(jnp.bfloat16)         # (128,128)
        b = jnp.zeros((1, HIDDEN), jnp.float32)                          # GCN bias=0
        p[f"bt{l}"] = jnp.tile(b, (1, NUM_JOINTS))                       # (1,128)

    # BatchNorm joint-pool matrix: kron(ones(J,J)/J, I_hidden)
    p["pool"] = jnp.kron(
        jnp.full((NUM_JOINTS, NUM_JOINTS), 1.0 / NUM_JOINTS, jnp.float32),
        jnp.eye(HIDDEN, dtype=jnp.float32))                              # (128,128)

    p["w_lat"] = lin(keys[4], D, D).astype(jnp.bfloat16)
    p["b_lat"] = jnp.zeros((1, D), jnp.float32)

    cb = jax.random.normal(keys[5], (CODEBOOK, D), jnp.float32).astype(jnp.bfloat16)
    p["cb"] = cb                                                         # (K,D) bf16
    p["cbt"] = jnp.transpose(cb)                                         # (D,K) bf16
    p["c_sq"] = jnp.sum(cb.astype(jnp.float32) ** 2, axis=-1)[None, :]   # (1,K) f32

    p["w_dec1"] = lin(keys[6], D, D).astype(jnp.bfloat16)
    p["b_dec1"] = jnp.zeros((1, D), jnp.float32)
    w_node = lin(keys[7], D, OUT_JOINT)
    p["w_node"] = jnp.pad(w_node, ((0, 0), (0, D - OUT_JOINT))).astype(jnp.bfloat16)
    p["b_node"] = jnp.zeros((1, D), jnp.float32)                         # cols>=24 zero
    return p


# ------------------------------ loss helpers -----------------------------------
def entropy_regularization(indices, codebook_size):
    # TODO(synk): external helper; implemented as negative entropy of codebook usage.
    onehot = jax.nn.one_hot(indices.reshape(-1), codebook_size, dtype=jnp.float32)
    prob = jnp.mean(onehot, axis=0)
    return jnp.sum(prob * jnp.log(jnp.clip(prob, 1e-12)))


def avg_individual_entropy(indices):
    # TODO(synk): external helper; mean per-sequence entropy of index usage.
    onehot = jax.nn.one_hot(indices, CODEBOOK, dtype=jnp.float32)   # (B, F, K)
    prob = jnp.mean(onehot, axis=1)                                 # (B, K)
    ent = -jnp.sum(prob * jnp.log(jnp.clip(prob, 1e-12)), axis=-1)
    return jnp.mean(ent)


# ------------------------------ full forward ------------------------------------
def vqgnn_forward(x, distances, params):
    skel = params["skel"]

    # data.x: (N, C, 1) -> squeeze(-1)
    x_sq = jnp.squeeze(x, -1)                                       # (N, 3)
    real_node = x_sq.reshape(M, NUM_JOINTS, NUM_CHANNELS)           # (M, J, 3)

    # frame-major, channel-padded kernel input:  [m, j*16 + c] = x[m*J + j, c]
    x_frame = jnp.pad(real_node, ((0, 0), (0, 0), (0, C_PAD - NUM_CHANNELS)))
    x_frame = x_frame.reshape(M, NUM_JOINTS * C_PAD)                # (8, 128)

    z, quantized, onehot, joints_pad = vqgnn_pallas(x_frame, params)

    # vq_first returns commitment loss already scaled by commitment_weight;
    # loss_tuple below re-applies COMMIT_W, mirroring the reference module.
    commit_loss = COMMIT_W * jnp.mean((quantized - z) ** 2)
    indices = jnp.argmax(onehot, axis=-1).astype(jnp.int32)
    indices = indices.reshape(B_SIZE, SEQ_SIZE)                     # view(len(data.y), -1)

    entropy_loss = entropy_regularization(indices, CODEBOOK)
    individual_entropy_loss = avg_individual_entropy(indices)

    joints = joints_pad[:, :OUT_JOINT].reshape(M, NUM_JOINTS, 3)

    speed_loss = jnp.float32(0.0)          # preprocess.args.add_features == False
    acceleration_loss = jnp.float32(0.0)

    # MEDLoss (external): mean Euclidean distance between real and predicted nodes.
    # TODO(synk): MEDLoss source not given; implemented as mean per-joint L2 distance.
    feature_rec_loss = jnp.mean(jnp.sqrt(jnp.sum((real_node - joints) ** 2, axis=-1)))

    start = joints[:, skel[0]]                                      # (M, E, 3)
    end = joints[:, skel[1]]
    vectors = end - start
    pred_distances = jnp.sqrt(jnp.sum(vectors ** 2, axis=2))        # (M, E)
    distance_loss = LAMB_DIST * jnp.mean((distances - pred_distances) ** 2)

    # all_distance = True branch overrides distance_loss (unweighted), and
    # LAMB_DIST is re-applied only inside loss_tuple — mirrors the module.
    def _cdist(a):
        diff = a[:, :, None, :] - a[:, None, :, :]
        return jnp.sqrt(jnp.sum(diff * diff, axis=-1))

    pred_all = jnp.triu(_cdist(joints), k=1)
    real_all = jnp.triu(_cdist(real_node), k=1)
    distance_loss = jnp.mean((real_all - pred_all) ** 2)

    loss_no_weights = (feature_rec_loss, commit_loss, distance_loss,
                       entropy_loss, individual_entropy_loss,
                       speed_loss, acceleration_loss)
    loss_tuple = (LAMB_NODE * feature_rec_loss, COMMIT_W * commit_loss,
                  LAMB_DIST * distance_loss, LAMB_ENTROPY * individual_entropy_loss,
                  LAMB_SPEED * speed_loss, LAMB_ACC * acceleration_loss)
    return joints, pred_distances, loss_no_weights, loss_tuple, quantized


# ---------------------------------- main -----------------------------------------
if __name__ == "__main__":
    key = jax.random.PRNGKey(0)
    k_p, k_x, k_d = jax.random.split(key, 3)

    params = init_params(k_p)

    x = jax.random.normal(k_x, (N, NUM_CHANNELS, 1), jnp.float32)            # data.x
    n_edges = 2 * (NUM_JOINTS - 1)
    distances = jax.random.uniform(k_d, (M, n_edges), jnp.float32)           # data.distance1

    fwd = jax.jit(lambda x_, d_: vqgnn_forward(x_, d_, params))
    out = fwd(x, distances)
    jax.block_until_ready(out)
    print("KERNEL_OK")
</pallas_src>

<mosaic_0001>
module attributes {stable_mosaic.version = 11 : i64} {
  func.func @_vqgnn_kernel(%arg0: memref<8x128xf32, #tpu.memory_space<vmem>>, %arg1: memref<128x128xbf16, #tpu.memory_space<vmem>>, %arg2: memref<1x128xf32, #tpu.memory_space<vmem>>, %arg3: memref<128x128xbf16, #tpu.memory_space<vmem>>, %arg4: memref<1x128xf32, #tpu.memory_space<vmem>>, %arg5: memref<128x128xbf16, #tpu.memory_space<vmem>>, %arg6: memref<1x128xf32, #tpu.memory_space<vmem>>, %arg7: memref<128x128xbf16, #tpu.memory_space<vmem>>, %arg8: memref<1x128xf32, #tpu.memory_space<vmem>>, %arg9: memref<128x128xf32, #tpu.memory_space<vmem>>, %arg10: memref<128x128xbf16, #tpu.memory_space<vmem>>, %arg11: memref<1x128xf32, #tpu.memory_space<vmem>>, %arg12: memref<128x128xbf16, #tpu.memory_space<vmem>>, %arg13: memref<128x128xbf16, #tpu.memory_space<vmem>>, %arg14: memref<1x128xf32, #tpu.memory_space<vmem>>, %arg15: memref<128x128xbf16, #tpu.memory_space<vmem>>, %arg16: memref<1x128xf32, #tpu.memory_space<vmem>>, %arg17: memref<128x128xbf16, #tpu.memory_space<vmem>>, %arg18: memref<1x128xf32, #tpu.memory_space<vmem>>, %arg19: memref<8x128xf32, #tpu.memory_space<vmem>>, %arg20: memref<8x128xf32, #tpu.memory_space<vmem>>, %arg21: memref<8x128xf32, #tpu.memory_space<vmem>>, %arg22: memref<8x128xf32, #tpu.memory_space<vmem>>) attributes {dimension_semantics = [], scalar_prefetch = 0 : i64, scratch_operands = 0 : i64, tpu.core_type = #tpu.core_type<tc>} {
    %c0 = arith.constant 0 : index
    %c0_0 = arith.constant 0 : index
    %0 = vector.load %arg9[%c0, %c0_0] : memref<128x128xf32, #tpu.memory_space<vmem>>, vector<128x128xf32>
    %c0_1 = arith.constant 0 : index
    %c0_2 = arith.constant 0 : index
    %1 = vector.load %arg0[%c0_1, %c0_2] : memref<8x128xf32, #tpu.memory_space<vmem>>, vector<8x128xf32>
    %2 = arith.truncf %1 : vector<8x128xf32> to vector<8x128xbf16>
    %c0_3 = arith.constant 0 : index
    %c0_4 = arith.constant 0 : index
    %3 = vector.load %arg1[%c0_3, %c0_4] : memref<128x128xbf16, #tpu.memory_space<vmem>>, vector<128x128xbf16>
    %cst = arith.constant dense<0.000000e+00> : vector<8x128xf32>
    %4 = tpu.matmul %2, %3, %cst {dimension_numbers = #tpu.dot_dimension_numbers<[1], [0], [0], [1], [0, 0, 1, 1], [], []>} : vector<8x128xbf16>, vector<128x128xbf16>, vector<8x128xf32> -> vector<8x128xf32>
    %c0_5 = arith.constant 0 : index
    %c0_6 = arith.constant 0 : index
    %5 = vector.load %arg2[%c0_5, %c0_6] : memref<1x128xf32, #tpu.memory_space<vmem>>, vector<1x128xf32>
    %6 = vector.broadcast %5 : vector<1x128xf32> to vector<8x128xf32>
    %7 = arith.addf %4, %6 : vector<8x128xf32>
    %cst_7 = arith.constant 5.000000e-01 : f32
    %8 = vector.broadcast %cst_7 : f32 to vector<8x128xf32>
    %9 = arith.mulf %8, %7 : vector<8x128xf32>
    %cst_8 = arith.constant 4.471500e-02 : f32
    %10 = vector.broadcast %cst_8 : f32 to vector<8x128xf32>
    %11 = arith.mulf %10, %7 : vector<8x128xf32>
    %12 = arith.mulf %11, %7 : vector<8x128xf32>
    %13 = arith.mulf %12, %7 : vector<8x128xf32>
    %14 = arith.addf %7, %13 : vector<8x128xf32>
    %cst_9 = arith.constant 0.797884583 : f32
    %15 = vector.broadcast %cst_9 : f32 to vector<8x128xf32>
    %16 = arith.mulf %15, %14 : vector<8x128xf32>
    %17 = math.tanh %16 : vector<8x128xf32>
    %cst_10 = arith.constant 1.000000e+00 : f32
    %18 = vector.broadcast %cst_10 : f32 to vector<8x128xf32>
    %19 = arith.addf %18, %17 : vector<8x128xf32>
    %20 = arith.mulf %9, %19 : vector<8x128xf32>
    %cst_11 = arith.constant dense<0.000000e+00> : vector<128xf32>
    %21 = vector.multi_reduction <add>, %20, %cst_11 [0] : vector<8x128xf32> to vector<128xf32>
    %22 = vector.shape_cast %21 : vector<128xf32> to vector<1x128xf32>
    %cst_12 = arith.constant 8.000000e+00 : f32
    %23 = vector.broadcast %cst_12 : f32 to vector<1x128xf32>
    %24 = arith.divf %22, %23 : vector<1x128xf32>
    %cst_13 = arith.constant dense<0.000000e+00> : vector<1x128xf32>
    %25 = tpu.matmul %24, %0, %cst_13 {dimension_numbers = #tpu.dot_dimension_numbers<[1], [0], [0], [1], [0, 0, 1, 1], [], []>} : vector<1x128xf32>, vector<128x128xf32>, vector<1x128xf32> -> vector<1x128xf32>
    %26 = vector.broadcast %25 : vector<1x128xf32> to vector<8x128xf32>
    %27 = arith.subf %20, %26 : vector<8x128xf32>
    %28 = arith.mulf %27, %27 : vector<8x128xf32>
    %cst_14 = arith.constant dense<0.000000e+00> : vector<128xf32>
    %29 = vector.multi_reduction <add>, %28, %cst_14 [0] : vector<8x128xf32> to vector<128xf32>
    %30 = vector.shape_cast %29 : vector<128xf32> to vector<1x128xf32>
    %cst_15 = arith.constant 8.000000e+00 : f32
    %31 = vector.broadcast %cst_15 : f32 to vector<1x128xf32>
    %32 = arith.divf %30, %31 : vector<1x128xf32>
    %cst_16 = arith.constant dense<0.000000e+00> : vector<1x128xf32>
    %33 = tpu.matmul %32, %0, %cst_16 {dimension_numbers = #tpu.dot_dimension_numbers<[1], [0], [0], [1], [0, 0, 1, 1], [], []>} : vector<1x128xf32>, vector<128x128xf32>, vector<1x128xf32> -> vector<1x128xf32>
    %cst_17 = arith.constant 9.99999974E-6 : f32
    %34 = vector.broadcast %cst_17 : f32 to vector<1x128xf32>
    %35 = arith.addf %33, %34 : vector<1x128xf32>
    %36 = math.rsqrt %35 : vector<1x128xf32>
    %37 = vector.broadcast %36 : vector<1x128xf32> to vector<8x128xf32>
    %38 = arith.mulf %27, %37 : vector<8x128xf32>
    %39 = arith.truncf %38 : vector<8x128xf32> to vector<8x128xbf16>
    %c0_18 = arith.constant 0 : index
    %c0_19 = arith.constant 0 : index
    %40 = vector.load %arg3[%c0_18, %c0_19] : memref<128x128xbf16, #tpu.memory_space<vmem>>, vector<128x128xbf16>
    %cst_20 = arith.constant dense<0.000000e+00> : vector<8x128xf32>
    %41 = tpu.matmul %39, %40, %cst_20 {dimension_numbers = #tpu.dot_dimension_numbers<[1], [0], [0], [1], [0, 0, 1, 1], [], []>} : vector<8x128xbf16>, vector<128x128xbf16>, vector<8x128xf32> -> vector<8x128xf32>
    %c0_21 = arith.constant 0 : index
    %c0_22 = arith.constant 0 : index
    %42 = vector.load %arg4[%c0_21, %c0_22] : memref<1x128xf32, #tpu.memory_space<vmem>>, vector<1x128xf32>
    %43 = vector.broadcast %42 : vector<1x128xf32> to vector<8x128xf32>
    %44 = arith.addf %41, %43 : vector<8x128xf32>
    %cst_23 = arith.constant 5.000000e-01 : f32
    %45 = vector.broadcast %cst_23 : f32 to vector<8x128xf32>
    %46 = arith.mulf %45, %44 : vector<8x128xf32>
    %cst_24 = arith.constant 4.471500e-02 : f32
    %47 = vector.broadcast %cst_24 : f32 to vector<8x128xf32>
    %48 = arith.mulf %47, %44 : vector<8x128xf32>
    %49 = arith.mulf %48, %44 : vector<8x128xf32>
    %50 = arith.mulf %49, %44 : vector<8x128xf32>
    %51 = arith.addf %44, %50 : vector<8x128xf32>
    %cst_25 = arith.constant 0.797884583 : f32
    %52 = vector.broadcast %cst_25 : f32 to vector<8x128xf32>
    %53 = arith.mulf %52, %51 : vector<8x128xf32>
    %54 = math.tanh %53 : vector<8x128xf32>
    %cst_26 = arith.constant 1.000000e+00 : f32
    %55 = vector.broadcast %cst_26 : f32 to vector<8x128xf32>
    %56 = arith.addf %55, %54 : vector<8x128xf32>
    %57 = arith.mulf %46, %56 : vector<8x128xf32>
    %cst_27 = arith.constant dense<0.000000e+00> : vector<128xf32>
    %58 = vector.multi_reduction <add>, %57, %cst_27 [0] : vector<8x128xf32> to vector<128xf32>
    %59 = vector.shape_cast %58 : vector<128xf32> to vector<1x128xf32>
    %cst_28 = arith.constant 8.000000e+00 : f32
    %60 = vector.broadcast %cst_28 : f32 to vector<1x128xf32>
    %61 = arith.divf %59, %60 : vector<1x128xf32>
    %cst_29 = arith.constant dense<0.000000e+00> : vector<1x128xf32>
    %62 = tpu.matmul %61, %0, %cst_29 {dimension_numbers = #tpu.dot_dimension_numbers<[1], [0], [0], [1], [0, 0, 1, 1], [], []>} : vector<1x128xf32>, vector<128x128xf32>, vector<1x128xf32> -> vector<1x128xf32>
    %63 = vector.broadcast %62 : vector<1x128xf32> to vector<8x128xf32>
    %64 = arith.subf %57, %63 : vector<8x128xf32>
    %65 = arith.mulf %64, %64 : vector<8x128xf32>
    %cst_30 = arith.constant dense<0.000000e+00> : vector<128xf32>
    %66 = vector.multi_reduction <add>, %65, %cst_30 [0] : vector<8x128xf32> to vector<128xf32>
    %67 = vector.shape_cast %66 : vector<128xf32> to vector<1x128xf32>
    %cst_31 = arith.constant 8.000000e+00 : f32
    %68 = vector.broadcast %cst_31 : f32 to vector<1x128xf32>
    %69 = arith.divf %67, %68 : vector<1x128xf32>
    %cst_32 = arith.constant dense<0.000000e+00> : vector<1x128xf32>
    %70 = tpu.matmul %69, %0, %cst_32 {dimension_numbers = #tpu.dot_dimension_numbers<[1], [0], [0], [1], [0, 0, 1, 1], [], []>} : vector<1x128xf32>, vector<128x128xf32>, vector<1x128xf32> -> vector<1x128xf32>
    %cst_33 = arith.constant 9.99999974E-6 : f32
    %71 = vector.broadcast %cst_33 : f32 to vector<1x128xf32>
    %72 = arith.addf %70, %71 : vector<1x128xf32>
    %73 = math.rsqrt %72 : vector<1x128xf32>
    %74 = vector.broadcast %73 : vector<1x128xf32> to vector<8x128xf32>
    %75 = arith.mulf %64, %74 : vector<8x128xf32>
    %76 = arith.truncf %75 : vector<8x128xf32> to vector<8x128xbf16>
    %c0_34 = arith.constant 0 : index
    %c0_35 = arith.constant 0 : index
    %77 = vector.load %arg5[%c0_34, %c0_35] : memref<128x128xbf16, #tpu.memory_space<vmem>>, vector<128x128xbf16>
    %cst_36 = arith.constant dense<0.000000e+00> : vector<8x128xf32>
    %78 = tpu.matmul %76, %77, %cst_36 {dimension_numbers = #tpu.dot_dimension_numbers<[1], [0], [0], [1], [0, 0, 1, 1], [], []>} : vector<8x128xbf16>, vector<128x128xbf16>, vector<8x128xf32> -> vector<8x128xf32>
    %c0_37 = arith.constant 0 : index
    %c0_38 = arith.constant 0 : index
    %79 = vector.load %arg6[%c0_37, %c0_38] : memref<1x128xf32, #tpu.memory_space<vmem>>, vector<1x128xf32>
    %80 = vector.broadcast %79 : vector<1x128xf32> to vector<8x128xf32>
    %81 = arith.addf %78, %80 : vector<8x128xf32>
    %cst_39 = arith.constant 5.000000e-01 : f32
    %82 = vector.broadcast %cst_39 : f32 to vector<8x128xf32>
    %83 = arith.mulf %82, %81 : vector<8x128xf32>
    %cst_40 = arith.constant 4.471500e-02 : f32
    %84 = vector.broadcast %cst_40 : f32 to vector<8x128xf32>
    %85 = arith.mulf %84, %81 : vector<8x128xf32>
    %86 = arith.mulf %85, %81 : vector<8x128xf32>
    %87 = arith.mulf %86, %81 : vector<8x128xf32>
    %88 = arith.addf %81, %87 : vector<8x128xf32>
    %cst_41 = arith.constant 0.797884583 : f32
    %89 = vector.broadcast %cst_41 : f32 to vector<8x128xf32>
    %90 = arith.mulf %89, %88 : vector<8x128xf32>
    %91 = math.tanh %90 : vector<8x128xf32>
    %cst_42 = arith.constant 1.000000e+00 : f32
    %92 = vector.broadcast %cst_42 : f32 to vector<8x128xf32>
    %93 = arith.addf %92, %91 : vector<8x128xf32>
    %94 = arith.mulf %83, %93 : vector<8x128xf32>
    %cst_43 = arith.constant dense<0.000000e+00> : vector<128xf32>
    %95 = vector.multi_reduction <add>, %94, %cst_43 [0] : vector<8x128xf32> to vector<128xf32>
    %96 = vector.shape_cast %95 : vector<128xf32> to vector<1x128xf32>
    %cst_44 = arith.constant 8.000000e+00 : f32
    %97 = vector.broadcast %cst_44 : f32 to vector<1x128xf32>
    %98 = arith.divf %96, %97 : vector<1x128xf32>
    %cst_45 = arith.constant dense<0.000000e+00> : vector<1x128xf32>
    %99 = tpu.matmul %98, %0, %cst_45 {dimension_numbers = #tpu.dot_dimension_numbers<[1], [0], [0], [1], [0, 0, 1, 1], [], []>} : vector<1x128xf32>, vector<128x128xf32>, vector<1x128xf32> -> vector<1x128xf32>
    %100 = vector.broadcast %99 : vector<1x128xf32> to vector<8x128xf32>
    %101 = arith.subf %94, %100 : vector<8x128xf32>
    %102 = arith.mulf %101, %101 : vector<8x128xf32>
    %cst_46 = arith.constant dense<0.000000e+00> : vector<128xf32>
    %103 = vector.multi_reduction <add>, %102, %cst_46 [0] : vector<8x128xf32> to vector<128xf32>
    %104 = vector.shape_cast %103 : vector<128xf32> to vector<1x128xf32>
    %cst_47 = arith.constant 8.000000e+00 : f32
    %105 = vector.broadcast %cst_47 : f32 to vector<1x128xf32>
    %106 = arith.divf %104, %105 : vector<1x128xf32>
    %cst_48 = arith.constant dense<0.000000e+00> : vector<1x128xf32>
    %107 = tpu.matmul %106, %0, %cst_48 {dimension_numbers = #tpu.dot_dimension_numbers<[1], [0], [0], [1], [0, 0, 1, 1], [], []>} : vector<1x128xf32>, vector<128x128xf32>, vector<1x128xf32> -> vector<1x128xf32>
    %cst_49 = arith.constant 9.99999974E-6 : f32
    %108 = vector.broadcast %cst_49 : f32 to vector<1x128xf32>
    %109 = arith.addf %107, %108 : vector<1x128xf32>
    %110 = math.rsqrt %109 : vector<1x128xf32>
    %111 = vector.broadcast %110 : vector<1x128xf32> to vector<8x128xf32>
    %112 = arith.mulf %101, %111 : vector<8x128xf32>
    %113 = arith.truncf %112 : vector<8x128xf32> to vector<8x128xbf16>
    %c0_50 = arith.constant 0 : index
    %c0_51 = arith.constant 0 : index
    %114 = vector.load %arg7[%c0_50, %c0_51] : memref<128x128xbf16, #tpu.memory_space<vmem>>, vector<128x128xbf16>
    %cst_52 = arith.constant dense<0.000000e+00> : vector<8x128xf32>
    %115 = tpu.matmul %113, %114, %cst_52 {dimension_numbers = #tpu.dot_dimension_numbers<[1], [0], [0], [1], [0, 0, 1, 1], [], []>} : vector<8x128xbf16>, vector<128x128xbf16>, vector<8x128xf32> -> vector<8x128xf32>
    %c0_53 = arith.constant 0 : index
    %c0_54 = arith.constant 0 : index
    %116 = vector.load %arg8[%c0_53, %c0_54] : memref<1x128xf32, #tpu.memory_space<vmem>>, vector<1x128xf32>
    %117 = vector.broadcast %116 : vector<1x128xf32> to vector<8x128xf32>
    %118 = arith.addf %115, %117 : vector<8x128xf32>
    %cst_55 = arith.constant 5.000000e-01 : f32
    %119 = vector.broadcast %cst_55 : f32 to vector<8x128xf32>
    %120 = arith.mulf %119, %118 : vector<8x128xf32>
    %cst_56 = arith.constant 4.471500e-02 : f32
    %121 = vector.broadcast %cst_56 : f32 to vector<8x128xf32>
    %122 = arith.mulf %121, %118 : vector<8x128xf32>
    %123 = arith.mulf %122, %118 : vector<8x128xf32>
    %124 = arith.mulf %123, %118 : vector<8x128xf32>
    %125 = arith.addf %118, %124 : vector<8x128xf32>
    %cst_57 = arith.constant 0.797884583 : f32
    %126 = vector.broadcast %cst_57 : f32 to vector<8x128xf32>
    %127 = arith.mulf %126, %125 : vector<8x128xf32>
    %128 = math.tanh %127 : vector<8x128xf32>
    %cst_58 = arith.constant 1.000000e+00 : f32
    %129 = vector.broadcast %cst_58 : f32 to vector<8x128xf32>
    %130 = arith.addf %129, %128 : vector<8x128xf32>
    %131 = arith.mulf %120, %130 : vector<8x128xf32>
    %132 = arith.truncf %131 : vector<8x128xf32> to vector<8x128xbf16>
    %c0_59 = arith.constant 0 : index
    %c0_60 = arith.constant 0 : index
    %133 = vector.load %arg10[%c0_59, %c0_60] : memref<128x128xbf16, #tpu.memory_space<vmem>>, vector<128x128xbf16>
    %cst_61 = arith.constant dense<0.000000e+00> : vector<8x128xf32>
    %134 = tpu.matmul %132, %133, %cst_61 {dimension_numbers = #tpu.dot_dimension_numbers<[1], [0], [0], [1], [0, 0, 1, 1], [], []>} : vector<8x128xbf16>, vector<128x128xbf16>, vector<8x128xf32> -> vector<8x128xf32>
    %c0_62 = arith.constant 0 : index
    %c0_63 = arith.constant 0 : index
    %135 = vector.load %arg11[%c0_62, %c0_63] : memref<1x128xf32, #tpu.memory_space<vmem>>, vector<1x128xf32>
    %136 = vector.broadcast %135 : vector<1x128xf32> to vector<8x128xf32>
    %137 = arith.addf %134, %136 : vector<8x128xf32>
    %c0_64 = arith.constant 0 : index
    %c0_65 = arith.constant 0 : index
    %138 = vector.load %arg19[%c0_64, %c0_65] : memref<8x128xf32, #tpu.memory_space<vmem>>, vector<8x128xf32>
    tpu.vector_store %arg19[%c0_64, %c0_65], %137 {strides = array<i32>} : memref<8x128xf32, #tpu.memory_space<vmem>>, vector<8x128xf32>,
    %139 = arith.truncf %137 : vector<8x128xf32> to vector<8x128xbf16>
    %c0_66 = arith.constant 0 : index
    %c0_67 = arith.constant 0 : index
    %140 = vector.load %arg12[%c0_66, %c0_67] : memref<128x128xbf16, #tpu.memory_space<vmem>>, vector<128x128xbf16>
    %cst_68 = arith.constant dense<0.000000e+00> : vector<8x128xf32>
    %141 = tpu.matmul %139, %140, %cst_68 {dimension_numbers = #tpu.dot_dimension_numbers<[1], [0], [0], [1], [0, 0, 1, 1], [], []>} : vector<8x128xbf16>, vector<128x128xbf16>, vector<8x128xf32> -> vector<8x128xf32>
    %c0_69 = arith.constant 0 : index
    %c0_70 = arith.constant 0 : index
    %142 = vector.load %arg14[%c0_69, %c0_70] : memref<1x128xf32, #tpu.memory_space<vmem>>, vector<1x128xf32>
    %cst_71 = arith.constant 2.000000e+00 : f32
    %143 = vector.broadcast %cst_71 : f32 to vector<8x128xf32>
    %144 = arith.mulf %143, %141 : vector<8x128xf32>
    %145 = vector.broadcast %142 : vector<1x128xf32> to vector<8x128xf32>
    %146 = arith.subf %145, %144 : vector<8x128xf32>
    %cst_72 = arith.constant dense<0x7F800000> : vector<8xf32>
    %147 = vector.multi_reduction <minimumf>, %146, %cst_72 [1] : vector<8x128xf32> to vector<8xf32>
    %148 = vector.shape_cast %147 : vector<8xf32> to vector<8x1xf32>
    %149 = tpu.iota {dimensions = array<i32: 1>} : vector<8x128xi32>
    %150 = vector.broadcast %148 : vector<8x1xf32> to vector<8x128xf32>
    %151 = arith.cmpf ole, %146, %150 : vector<8x128xf32>
    %c128_i32 = arith.constant 128 : i32
    %152 = vector.broadcast %c128_i32 : i32 to vector<8x128xi32>
    %153 = arith.select %151, %149, %152 : vector<8x128xi1>, vector<8x128xi32>
    %cst_73 = arith.constant dense<2147483647> : vector<8xi32>
    %154 = vector.multi_reduction <minsi>, %153, %cst_73 [1] : vector<8x128xi32> to vector<8xi32>
    %155 = vector.shape_cast %154 : vector<8xi32> to vector<8x1xi32>
    %156 = vector.broadcast %155 : vector<8x1xi32> to vector<8x128xi32>
    %157 = arith.cmpi eq, %149, %156 : vector<8x128xi32>
    %158 = arith.extui %157 : vector<8x128xi1> to vector<8x128xi32>
    %159 = arith.sitofp %158 : vector<8x128xi32> to vector<8x128xf32>
    %c0_74 = arith.constant 0 : index
    %c0_75 = arith.constant 0 : index
    %160 = vector.load %arg21[%c0_74, %c0_75] : memref<8x128xf32, #tpu.memory_space<vmem>>, vector<8x128xf32>
    tpu.vector_store %arg21[%c0_74, %c0_75], %159 {strides = array<i32>} : memref<8x128xf32, #tpu.memory_space<vmem>>, vector<8x128xf32>,
    %161 = arith.truncf %159 : vector<8x128xf32> to vector<8x128xbf16>
    %c0_76 = arith.constant 0 : index
    %c0_77 = arith.constant 0 : index
    %162 = vector.load %arg13[%c0_76, %c0_77] : memref<128x128xbf16, #tpu.memory_space<vmem>>, vector<128x128xbf16>
    %cst_78 = arith.constant dense<0.000000e+00> : vector<8x128xf32>
    %163 = tpu.matmul %161, %162, %cst_78 {dimension_numbers = #tpu.dot_dimension_numbers<[1], [0], [0], [1], [0, 0, 1, 1], [], []>} : vector<8x128xbf16>, vector<128x128xbf16>, vector<8x128xf32> -> vector<8x128xf32>
    %c0_79 = arith.constant 0 : index
    %c0_80 = arith.constant 0 : index
    %164 = vector.load %arg20[%c0_79, %c0_80] : memref<8x128xf32, #tpu.memory_space<vmem>>, vector<8x128xf32>
    tpu.vector_store %arg20[%c0_79, %c0_80], %163 {strides = array<i32>} : memref<8x128xf32, #tpu.memory_space<vmem>>, vector<8x128xf32>,
    %165 = arith.truncf %163 : vector<8x128xf32> to vector<8x128xbf16>
    %c0_81 = arith.constant 0 : index
    %c0_82 = arith.constant 0 : index
    %166 = vector.load %arg15[%c0_81, %c0_82] : memref<128x128xbf16, #tpu.memory_space<vmem>>, vector<128x128xbf16>
    %cst_83 = arith.constant dense<0.000000e+00> : vector<8x128xf32>
    %167 = tpu.matmul %165, %166, %cst_83 {dimension_numbers = #tpu.dot_dimension_numbers<[1], [0], [0], [1], [0, 0, 1, 1], [], []>} : vector<8x128xbf16>, vector<128x128xbf16>, vector<8x128xf32> -> vector<8x128xf32>
    %c0_84 = arith.constant 0 : index
    %c0_85 = arith.constant 0 : index
    %168 = vector.load %arg16[%c0_84, %c0_85] : memref<1x128xf32, #tpu.memory_space<vmem>>, vector<1x128xf32>
    %169 = vector.broadcast %168 : vector<1x128xf32> to vector<8x128xf32>
    %170 = arith.addf %167, %169 : vector<8x128xf32>
    %cst_86 = arith.constant 5.000000e-01 : f32
    %171 = vector.broadcast %cst_86 : f32 to vector<8x128xf32>
    %172 = arith.mulf %171, %170 : vector<8x128xf32>
    %cst_87 = arith.constant 4.471500e-02 : f32
    %173 = vector.broadcast %cst_87 : f32 to vector<8x128xf32>
    %174 = arith.mulf %173, %170 : vector<8x128xf32>
    %175 = arith.mulf %174, %170 : vector<8x128xf32>
    %176 = arith.mulf %175, %170 : vector<8x128xf32>
    %177 = arith.addf %170, %176 : vector<8x128xf32>
    %cst_88 = arith.constant 0.797884583 : f32
    %178 = vector.broadcast %cst_88 : f32 to vector<8x128xf32>
    %179 = arith.mulf %178, %177 : vector<8x128xf32>
    %180 = math.tanh %179 : vector<8x128xf32>
    %cst_89 = arith.constant 1.000000e+00 : f32
    %181 = vector.broadcast %cst_89 : f32 to vector<8x128xf32>
    %182 = arith.addf %181, %180 : vector<8x128xf32>
    %183 = arith.mulf %172, %182 : vector<8x128xf32>
    %184 = arith.truncf %183 : vector<8x128xf32> to vector<8x128xbf16>
    %c0_90 = arith.constant 0 : index
    %c0_91 = arith.constant 0 : index
    %185 = vector.load %arg17[%c0_90, %c0_91] : memref<128x128xbf16, #tpu.memory_space<vmem>>, vector<128x128xbf16>
    %cst_92 = arith.constant dense<0.000000e+00> : vector<8x128xf32>
    %186 = tpu.matmul %184, %185, %cst_92 {dimension_numbers = #tpu.dot_dimension_numbers<[1], [0], [0], [1], [0, 0, 1, 1], [], []>} : vector<8x128xbf16>, vector<128x128xbf16>, vector<8x128xf32> -> vector<8x128xf32>
    %c0_93 = arith.constant 0 : index
    %c0_94 = arith.constant 0 : index
    %187 = vector.load %arg18[%c0_93, %c0_94] : memref<1x128xf32, #tpu.memory_space<vmem>>, vector<1x128xf32>
    %188 = vector.broadcast %187 : vector<1x128xf32> to vector<8x128xf32>
    %189 = arith.addf %186, %188 : vector<8x128xf32>
    %c0_95 = arith.constant 0 : index
    %c0_96 = arith.constant 0 : index
    %190 = vector.load %arg22[%c0_95, %c0_96] : memref<8x128xf32, #tpu.memory_space<vmem>>, vector<8x128xf32>
    tpu.vector_store %arg22[%c0_95, %c0_96], %189 {strides = array<i32>} : memref<8x128xf32, #tpu.memory_space<vmem>>, vector<8x128xf32>,
    return
  }
}

</mosaic_0001>

<bundles_post_ra>
// kernel: squeeze.3
= control target key start
LH: loop header
LB: loop body
LE: loop exit
PB: predicated region body
PF: predicated region fallthrough
CT: control target
= control target key end

     0   :  { %s66_s8 = smov 104   ;;  %s67_s9 = smov 88   ;;  %vm7_vm0 = vcmask 64512   ;;  %s117_s0 = inlined_call_operand.vmem [shape: f32[64,3], index: 0, kind: input, shape index: {}]   ;;  %s118_s1 = inlined_call_operand.vmem [shape: f32[8,8,3], index: 1, kind: output, shape index: {}]  }
   0x1   :  { %v4_v0 = vld [vmem:[%s117_s0] sm:$0xf]  ;;  %s65_s0 = smov 120   ;;  %s68_s10 = smov 112  }
   0x2   :  { %5 = vst [vmem:[#allocation0] sm:$0xf] %v4_v0  ;;  %s69_s11 = smov 96   ;;  %s70_s12 = smov 80  }
   0x3   :  { %s71_s13 = smov 72  }
   0x9   :  { %v9_v1 = vld [vmem:[#allocation0] sm:$0x7]  }
   0xa   :  { %v21_v2 = vld [vmem:[#allocation0] sm:$0x7]   ;;  %10 = vrot.lane.b32.xlu0 %v9_v1, %s65_s0 }
   0xb   :  { %22 = vrot.lane.b32.xlu1 %v21_v2, %s66_s8  ;;  %v33_v3 = vld [vmem:[#allocation0] sm:$0x7]  }
   0xc   :  { %34 = vrot.lane.b32.xlu2 %v33_v3, %s67_s9  ;;  %v15_v4 = vld [vmem:[#allocation0] sm:$0x7]  }
   0xd   :  { %v27_v5 = vld [vmem:[#allocation0] sm:$0x7]  }
   0xe   :  { %v39_v6 = vld [vmem:[#allocation0] sm:$0x7]  }
   0xf   :  { %v45_v7 = vld [vmem:[#allocation0] sm:$0x7]  }
  0x10   :  { %v6_v8 = vld [vmem:[#allocation0] sm:$0x7]  }
  0x11   :  { %8 = vst.msk [vmem:[%s118_s1] ss:$8 sm:$0x7] %vm7_vm0, %v6_v8  }
  0x12   :  { %16 = vrot.lane.b32.xlu0 %v15_v4, %s68_s10 }
  0x13   :  { %28 = vrot.lane.b32.xlu1 %v27_v5, %s69_s11 }
  0x14   :  { %40 = vrot.lane.b32.xlu2 %v39_v6, %s70_s12 }
  0x1a   :  { %46 = vrot.lane.b32.xlu0 %v45_v7, %s71_s13 }
  0x66   :  { %v35_v9 = vpop.permute.xlu2 %34  }
  0x67   :  { %55 = vst.msk [vmem:[%s118_s1 + $0x5] ss:$8 sm:$0x7] %vm7_vm0, %v35_v9  }
  0x6e   :  { %v41_v10 = vpop.permute.xlu2 %40  }
  0x6f   :  { %56 = vst.msk [vmem:[%s118_s1 + $0x6] ss:$8 sm:$0x7] %vm7_vm0, %v41_v10  }
  0x7c   :  { %v11_v11 = vpop.permute.xlu0 %10  }
  0x7d   :  { %v23_v12 = vpop.permute.xlu1 %22   ;;  %51 = vst.msk [vmem:[%s118_s1 + $0x1] ss:$8 sm:$0x7] %vm7_vm0, %v11_v11  }
  0x7e   :  { %53 = vst.msk [vmem:[%s118_s1 + $0x3] ss:$8 sm:$0x7] %vm7_vm0, %v23_v12  }
  0x84   :  { %v17_v13 = vpop.permute.xlu0 %16  }
  0x85   :  { %v29_v14 = vpop.permute.xlu1 %28   ;;  %52 = vst.msk [vmem:[%s118_s1 + $0x2] ss:$8 sm:$0x7] %vm7_vm0, %v17_v13  }
  0x86   :  { %54 = vst.msk [vmem:[%s118_s1 + $0x4] ss:$8 sm:$0x7] %vm7_vm0, %v29_v14  }
  0x8c   :  { %v47_v15 = vpop.permute.xlu0 %46  }
  0x8d   :  { %57 = vst.msk [vmem:[%s118_s1 + $0x7] ss:$8 sm:$0x7] %vm7_vm0, %v47_v15  }

// kernel: eq.16
= control target key start
LH: loop header
LB: loop body
LE: loop exit
PB: predicated region body
PF: predicated region fallthrough
CT: control target
= control target key end

     0   :  { %vm7_vm0 = vcmask 31744   ;;  %s39_s0 = inlined_call_operand.vmem [shape: s32[8], index: 0, kind: input, shape index: {}]   ;;  %s40_s1 = inlined_call_operand.vmem [shape: s32[2,4], index: 1, kind: output, shape index: {}]  }
   0x1   :  { %v4_v0 = vld [vmem:[%s39_s0] sm:$0x1]  ;;  %s22_s0 = smov 124  }
   0x2   :  { %5 = vst [vmem:[#allocation1] sm:$0x1] %v4_v0 }
   0x9   :  { %v9_v1 = vld [vmem:[#allocation1] sm:$0x1]  }
   0xa   :  { %v6_v2 = vld [vmem:[#allocation1] sm:$0x1]   ;;  %10 = vrot.lane.b32.xlu0 %v9_v1, %s22_s0 }
   0xb   :  { %8 = vst.msk [vmem:[#allocation0] sm:$0x1] %vm7_vm0, %v6_v2  }
  0x7c   :  { %v11_v3 = vpop.permute.xlu0 %10  }
  0x7d   :  { %14 = vst.msk [vmem:[#allocation0 + $0x1] sm:$0x1] %vm7_vm0, %v11_v3  }
  0x84   :  { %v17_v4 = vld [vmem:[#allocation0] sm:$0x3] }
  0x85   :  { %20 = vst [vmem:[%s40_s1] sm:$0x3] %v17_v4 }

// kernel: _lambda_.1
= control target key start
LH: loop header
LB: loop body
LE: loop exit
PB: predicated region body
PF: predicated region fallthrough
CT: control target
= control target key end

     0   :  { %s2228_s0 = inlined_call_operand.vmem [shape: f32[8,128], index: 0, kind: input, shape index: {}]   ;;  %s2229_s1 = inlined_call_operand.vmem [shape: bf16[128,128], index: 1, kind: input, shape index: {}]   ;;  %s2230_s2 = inlined_call_operand.vmem [shape: f32[1,128], index: 2, kind: input, shape index: {}, may-alias: {2,4,6,8,11,16,18}]   ;;  %s2231_s3 = inlined_call_operand.vmem [shape: bf16[128,128], index: 3, kind: input, shape index: {}]   ;;  %s2232_s4 = inlined_call_operand.vmem [shape: f32[1,128], index: 4, kind: input, shape index: {}, may-alias: {2,4,6,8,11,16,18}]   ;;  %s2233_s5 = inlined_call_operand.vmem [shape: bf16[128,128], index: 5, kind: input, shape index: {}]   ;;  %s2234_s6 = inlined_call_operand.vmem [shape: f32[1,128], index: 6, kind: input, shape index: {}, may-alias: {2,4,6,8,11,16,18}]   ;;  %s2235_s7 = inlined_call_operand.hbm [shape: bf16[128,128], index: 7, kind: input, shape index: {}]   ;;  %s2236_s8 = inlined_call_operand.vmem [shape: f32[1,128], index: 8, kind: input, shape index: {}, may-alias: {2,4,6,8,11,16,18}]   ;;  %s2237_s9 = inlined_call_operand.vmem [shape: f32[128,128], index: 9, kind: input, shape index: {}]   ;;  %s2238_s10 = inlined_call_operand.hbm [shape: bf16[128,128], index: 10, kind: input, shape index: {}]   ;;  %s2239_s11 = inlined_call_operand.vmem [shape: f32[1,128], index: 11, kind: input, shape index: {}, may-alias: {2,4,6,8,11,16,18}]   ;;  %s2240_s12 = inlined_call_operand.hbm [shape: bf16[128,128], index: 12, kind: input, shape index: {}]   ;;  %s2241_s13 = inlined_call_operand.hbm [shape: bf16[128,128], index: 13, kind: input, shape index: {}]   ;;  %s2242_s14 = inlined_call_operand.vmem [shape: f32[1,128], index: 14, kind: input, shape index: {}]   ;;  %s2243_s15 = inlined_call_operand.hbm [shape: bf16[128,128], index: 15, kind: input, shape index: {}]   ;;  %s2244_s16 = inlined_call_operand.vmem [shape: f32[1,128], index: 16, kind: input, shape index: {}, may-alias: {2,4,6,8,11,16,18}]   ;;  %s2245_s17 = inlined_call_operand.hbm [shape: bf16[128,128], index: 17, kind: input, shape index: {}]   ;;  %s2246_s18 = inlined_call_operand.vmem [shape: f32[1,128], index: 18, kind: input, shape index: {}, may-alias: {2,4,6,8,11,16,18}]   ;;  %s2247_s19 = inlined_call_operand.vmem [shape: f32[8,128], index: 19, kind: output, shape index: {0}]   ;;  %s2248_s20 = inlined_call_operand.vmem [shape: f32[8,128], index: 20, kind: output, shape index: {1}]   ;;  %s2249_s21 = inlined_call_operand.vmem [shape: f32[8,128], index: 21, kind: output, shape index: {2}]   ;;  %s2250_s22 = inlined_call_operand.vmem [shape: f32[8,128], index: 22, kind: output, shape index: {3}]  }
   0x1   :  { %2254 = sst [smem:[#allocation16_spill]] %s2228_s0 }
   0x2   :  { %2255 = sst [smem:[#allocation17_spill]] %s2229_s1 }
   0x3   :  { %2256 = sst [smem:[#allocation18_spill]] %s2230_s2 }
   0x4   :  { %2257 = sst [smem:[#allocation19_spill]] %s2231_s3 }
   0x5   :  { %2258 = sst [smem:[#allocation20_spill]] %s2232_s4 }
   0x6   :  { %2259 = sst [smem:[#allocation21_spill]] %s2233_s5 }
   0x7   :  { %2260 = sst [smem:[#allocation22_spill]] %s2234_s6 }
   0x8   :  { %28 = vsyncpa [#allocation3], 0 }
   0x9   :  { %29 = vsyncpa [#allocation5], 0 }
   0xa   :  { %30 = vsyncpa [#allocation8], 0 }
   0xb   :  { %31 = vsyncpa [#allocation11], 0  ;;  %s67_s29 = sshll.u32 %s2238_s10, 4  ;;  %s1771_s30 = smov [#allocation4]   ;;  %s68_s29 = int_to_ptr.hbm [resolvable:$true] %s67_s29 }
   0xc   :  { %s69_s4 = sshll.u32 %s1771_s30, 4  ;;  %s95_s1 = sshll.u32 %s2241_s13, 4  ;;  %s70_s4 = int_to_ptr.vmem [resolvable:$true] %s69_s4  ;;  %s96_s1 = int_to_ptr.hbm [resolvable:$true] %s95_s1 }
   0xd   :  { %s1772_s5 = smov 64   ;;  %s1773_s24 = smov 4  }
   0xe   :  { %75 = dma.hbm_to_vmem [thread:$0]  %s68_s29, 1024, %s70_s4, [#allocation5], %s1772_s5, %s1772_s5, %s1773_s24  }
   0xf   :  { %s1774_s6 = smov [#allocation7]   ;;  %s50_s10 = sshll.u32 %s2235_s7, 4  ;;  %s51_s10 = int_to_ptr.hbm [resolvable:$true] %s50_s10 }
  0x10   :  { %s97_s25 = sshll.u32 %s1774_s6, 4  ;;  %s82_s3 = sshll.u32 %s2240_s12, 4  ;;  %s98_s25 = int_to_ptr.vmem [resolvable:$true] %s97_s25  ;;  %s83_s3 = int_to_ptr.hbm [resolvable:$true] %s82_s3 }
  0x11   :  { %103 = dma.hbm_to_vmem [thread:$0]  %s96_s1, 1024, %s98_s25, [#allocation8], %s1772_s5, %s1772_s5, %s1773_s24  }
  0x12   :  { %s1775_s28 = smov [#allocation2]   ;;  %s1776_s29 = smov [#allocation6]  }
  0x13   :  { %s52_s30 = sshll.u32 %s1775_s28, 4  ;;  %s84_s7 = sshll.u32 %s1776_s29, 4  ;;  %s53_s30 = int_to_ptr.vmem [resolvable:$true] %s52_s30  ;;  %s85_s7 = int_to_ptr.vmem [resolvable:$true] %s84_s7 }
  0x14   :  { %58 = dma.hbm_to_vmem [thread:$0]  %s51_s10, 1024, %s53_s30, [#allocation3], %s1772_s5, %s1772_s5, %s1773_s24  }
  0x15   :  { %s110_s23 = sshll.u32 %s2243_s15, 4  ;;  %s125_s6 = sshll.u32 %s2245_s17, 4  ;;  %s111_s23 = int_to_ptr.hbm [resolvable:$true] %s110_s23  ;;  %s126_s6 = int_to_ptr.hbm [resolvable:$true] %s125_s6 }
  0x16   :  { %90 = dma.hbm_to_vmem [thread:$0]  %s83_s3, 1024, %s85_s7, [#allocation5], %s1772_s5, %s1772_s5, %s1773_s24  }
  0x17   :  { %s1777_s25 = smov [#allocation9]   ;;  %s1778_s2 = smov [#allocation10]  }
  0x18   :  { %s112_s26 = sshll.u32 %s1777_s25, 4  ;;  %s127_s15 = sshll.u32 %s1778_s2, 4  ;;  %s113_s26 = int_to_ptr.vmem [resolvable:$true] %s112_s26  ;;  %s128_s15 = int_to_ptr.vmem [resolvable:$true] %s127_s15 }
  0x19   :  { %118 = dma.hbm_to_vmem [thread:$0]  %s111_s23, 1024, %s113_s26, [#allocation8], %s1772_s5, %s1772_s5, %s1773_s24  }
  0x1a   :  { %133 = dma.hbm_to_vmem [thread:$0]  %s126_s6, 1024, %s128_s15, [#allocation11], %s1772_s5, %s1772_s5, %s1773_s24  }
  0x1b   :  { %1763 = dma.done.wait [#allocation3], 1024  }
  0x1c   :  { %1764 = vsyncadd [#allocation3], 4294966272 }
  0x1d   :  { %1765 = dma.done.wait [#allocation5], 2048  }
  0x1e   :  { %1766 = vsyncadd [#allocation5], 4294965248 }
  0x1f   :  { %1767 = dma.done.wait [#allocation8], 2048  }
  0x20   :  { %1768 = vsyncadd [#allocation8], 4294965248 }
  0x21   :  { %1769 = dma.done.wait [#allocation11], 1024  }
  0x22   :  { %1770 = vsyncadd [#allocation11], 4294966272  ;;  %s2261_s13 = sld [smem:[#allocation17_spill]]  ;;  %v1963_v10 = vld [vmem:[%s2237_s9 + $0x78] sm:$0xff]  ;;  %v1970_v11 = vld [vmem:[%s2237_s9 + $0x70] sm:$0xff]  ;;  %v1779_v33 = vmov 8.0  }
  0x23   :  { %s2262_s2 = sld [smem:[#allocation16_spill]]  ;;  %282 = vmatpush.msra.mxu1 %v1963_v10  ;;  %312 = vmatpush.msra.mxu2 %v1963_v10  ;;  %v1978_v12 = vld [vmem:[%s2237_s9 + $0x68] sm:$0xff]  ;;  %v1986_v13 = vld [vmem:[%s2237_s9 + $0x60] sm:$0xff]  ;;  %v1993_v14 = vld [vmem:[%s2237_s9 + $0x58] sm:$0xff]  ;;  %1601 = vrcp.f32 %v1779_v33 }
  0x24   :  { %v1999_v15 = vld [vmem:[%s2237_s9 + $0x50] sm:$0xff]  ;;  %v2007_v16 = vld [vmem:[%s2237_s9 + $0x48] sm:$0xff]  ;;  %v2015_v17 = vld [vmem:[%s2237_s9 + $0x40] sm:$0xff]  ;;  %s2263_s5 = sld [smem:[#allocation18_spill]] }
  0x25   :  { %283 = vmatpush.msra.mxu1 %v1970_v11  ;;  %313 = vmatpush.msra.mxu2 %v1970_v11  ;;  %v2023_v18 = vld [vmem:[%s2237_s9 + $0x38] sm:$0xff]  ;;  %v2031_v19 = vld [vmem:[%s2237_s9 + $0x30] sm:$0xff]  ;;  %v2039_v20 = vld [vmem:[%s2237_s9 + $0x28] sm:$0xff]  ;;  %s2264_s12 = sld [smem:[#allocation19_spill]] }
  0x26   :  { %v2047_v21 = vld [vmem:[%s2237_s9 + $0x20] sm:$0xff]  ;;  %v2055_v22 = vld [vmem:[%s2237_s9 + $0x18] sm:$0xff]  ;;  %v2066_v24 = vld [vmem:[%s2237_s9 + $0x10] sm:$0xff]  ;;  %s2265_s7 = sld [smem:[#allocation20_spill]] }
  0x27   :  { %284 = vmatpush.msra.mxu1 %v1978_v12  ;;  %314 = vmatpush.msra.mxu2 %v1978_v12  ;;  %v2074_v26 = vld [vmem:[%s2237_s9 + $0x8] sm:$0xff]  ;;  %v2082_v28 = vld [vmem:[%s2237_s9] sm:$0xff]  ;;  %s2266_s9 = sld [smem:[#allocation21_spill]] }
  0x28   :  { %v1517_v0 = vld [vmem:[%s2261_s13 + $0x38] sm:$0xff]  ;;  %v1516_v1 = vld [vmem:[%s2261_s13 + $0x30] sm:$0xff]  ;;  %v1515_v2 = vld [vmem:[%s2261_s13 + $0x28] sm:$0xff]  ;;  %s2267_s30 = sld [smem:[#allocation22_spill]] }
  0x29   :  { %246 = vmatpush.bf16.msra.mxu0 %v1517_v0  ;;  %v1514_v3 = vld [vmem:[%s2261_s13 + $0x20] sm:$0xff]  ;;  %v1513_v4 = vld [vmem:[%s2261_s13 + $0x18] sm:$0xff]  ;;  %v1512_v5 = vld [vmem:[%s2261_s13 + $0x10] sm:$0xff]  ;;  %285 = vmatpush.msra.mxu1 %v1986_v13  ;;  %v1602_v36 = vpop.eup %1601 }
  0x2a   :  { %v1511_v6 = vld [vmem:[%s2261_s13 + $0x8] sm:$0xff]  ;;  %v1510_v7 = vld [vmem:[%s2261_s13] sm:$0xff]  ;;  %315 = vmatpush.msra.mxu2 %v1986_v13  ;;  %v275_v37 = vmul.f32 8.0, %v1602_v36  ;;  %vm279_vm0 = vweird.f32 %v1602_v36 }
  0x2b   :  { %v176_v8 = vld [vmem:[%s2262_s2] sm:$0xff]  ;;  %286 = vmatpush.msra.mxu1 %v1993_v14  ;;  %v1525_v53 = vld [vmem:[%s2264_s12 + $0x38] sm:$0xff] }
  0x2c   :  { %v177_v9 = vpack.c.bf16 %v176_v8, %v176_v8  ;;  %316 = vmatpush.msra.mxu2 %v1993_v14  ;;  %v1593_v23 = vld [vmem:[%s2263_s5] ss:$0 sm:$0xff]  ;;  %v276_v41 = vsub.f32 1.0, %v275_v37  ;;  %413 = vmatpush.bf16.msra.mxu3 %v1525_v53 }
  0x2d   :  { %247 = vmatpush.bf16.msra.mxu0 %v1516_v1  ;;  %287 = vmatpush.msra.mxu1 %v1999_v15  ;;  %v1524_v1 = vld [vmem:[%s2264_s12 + $0x30] sm:$0xff] }
  0x2e   :  { %317 = vmatpush.msra.mxu2 %v1999_v15  ;;  %v277_v44 = vmul.f32 %v1602_v36, %v276_v41  ;;  %v1532_v53 = vld [vmem:[%s2266_s9 + $0x30] sm:$0xff] }
  0x2f   :  { %288 = vmatpush.msra.mxu1 %v2007_v16 }
  0x30   :  { %318 = vmatpush.msra.mxu2 %v2007_v16  ;;  %v278_v47 = vadd.f32 %v1602_v36, %v277_v44  ;;  %414 = vmatpush.bf16.msra.mxu3 %v1524_v1 }
  0x31   :  { %248 = vmatpush.bf16.msra.mxu0 %v1515_v2  ;;  %289 = vmatpush.msra.mxu1 %v2015_v17  ;;  %v1523_v2 = vld [vmem:[%s2264_s12 + $0x28] sm:$0xff] }
  0x32   :  { %319 = vmatpush.msra.mxu2 %v2015_v17  ;;  %v2118_v50 = vsel %vm279_vm0, %v1602_v36, %v278_v47 }
  0x33   :  { %290 = vmatpush.msra.mxu1 %v2023_v18 }
  0x34   :  { %320 = vmatpush.msra.mxu2 %v2023_v18  ;;  %415 = vmatpush.bf16.msra.mxu3 %v1523_v2 }
  0x35   :  { %249 = vmatpush.bf16.msra.mxu0 %v1514_v3  ;;  %291 = vmatpush.msra.mxu1 %v2031_v19  ;;  %v1522_v3 = vld [vmem:[%s2264_s12 + $0x20] sm:$0xff] }
  0x36   :  { %321 = vmatpush.msra.mxu2 %v2031_v19 }
  0x37   :  { %292 = vmatpush.msra.mxu1 %v2039_v20 }
  0x38   :  { %322 = vmatpush.msra.mxu2 %v2039_v20  ;;  %416 = vmatpush.bf16.msra.mxu3 %v1522_v3 }
  0x39   :  { %250 = vmatpush.bf16.msra.mxu0 %v1513_v4  ;;  %293 = vmatpush.msra.mxu1 %v2047_v21  ;;  %v1521_v4 = vld [vmem:[%s2264_s12 + $0x18] sm:$0xff] }
  0x3a   :  { %323 = vmatpush.msra.mxu2 %v2047_v21 }
  0x3b   :  { %294 = vmatpush.msra.mxu1 %v2055_v22 }
  0x3c   :  { %324 = vmatpush.msra.mxu2 %v2055_v22  ;;  %417 = vmatpush.bf16.msra.mxu3 %v1521_v4 }
  0x3d   :  { %251 = vmatpush.bf16.msra.mxu0 %v1512_v5  ;;  %295 = vmatpush.msra.mxu1 %v2066_v24  ;;  %v1520_v5 = vld [vmem:[%s2264_s12 + $0x10] sm:$0xff] }
  0x3e   :  { %325 = vmatpush.msra.mxu2 %v2066_v24 }
  0x3f   :  { %296 = vmatpush.msra.mxu1 %v2074_v26 }
  0x40   :  { %326 = vmatpush.msra.mxu2 %v2074_v26  ;;  %418 = vmatpush.bf16.msra.mxu3 %v1520_v5 }
  0x41   :  { %252 = vmatpush.bf16.msra.mxu0 %v1511_v6  ;;  %297 = vmatpush.msra.mxu1 %v2082_v28  ;;  %v1519_v6 = vld [vmem:[%s2264_s12 + $0x8] sm:$0xff] }
  0x42   :  { %327 = vmatpush.msra.mxu2 %v2082_v28 }
  0x43   :  { %472 = vmatpush.msrb.mxu1 %v1963_v10 }
  0x44   :  { %419 = vmatpush.bf16.msra.mxu3 %v1519_v6 }
  0x45   :  { %253 = vmatpush.bf16.msra.mxu0 %v1510_v7  ;;  %473 = vmatpush.msrb.mxu1 %v1970_v11  ;;  %v1518_v7 = vld [vmem:[%s2264_s12] sm:$0xff] }
  0x47   :  { %474 = vmatpush.msrb.mxu1 %v1978_v12 }
  0x48   :  { %254 = vmatmul.bf16.vlgmr.msra.gmra.mxu0 %v177_v9  ;;  %420 = vmatpush.bf16.msra.mxu3 %v1518_v7 }
  0x49   :  { %442 = vmatpush.msrb.mxu0 %v1963_v10  ;;  %475 = vmatpush.msrb.mxu1 %v1986_v13 }
  0x4b   :  { %443 = vmatpush.msrb.mxu0 %v1970_v11  ;;  %476 = vmatpush.msrb.mxu1 %v1993_v14 }
  0x4c   :  { %602 = vmatpush.msrb.mxu3 %v1963_v10 }
  0x4d   :  { %444 = vmatpush.msrb.mxu0 %v1978_v12  ;;  %477 = vmatpush.msrb.mxu1 %v1999_v15 }
  0x4e   :  { %603 = vmatpush.msrb.mxu3 %v1970_v11 }
  0x4f   :  { %445 = vmatpush.msrb.mxu0 %v1986_v13  ;;  %478 = vmatpush.msrb.mxu1 %v2007_v16 }
  0x50   :  { %604 = vmatpush.msrb.mxu3 %v1978_v12 }
  0x51   :  { %446 = vmatpush.msrb.mxu0 %v1993_v14  ;;  %479 = vmatpush.msrb.mxu1 %v2015_v17 }
  0x52   :  { %605 = vmatpush.msrb.mxu3 %v1986_v13 }
  0x53   :  { %447 = vmatpush.msrb.mxu0 %v1999_v15  ;;  %480 = vmatpush.msrb.mxu1 %v2023_v18 }
  0x54   :  { %606 = vmatpush.msrb.mxu3 %v1993_v14 }
  0x55   :  { %448 = vmatpush.msrb.mxu0 %v2007_v16  ;;  %481 = vmatpush.msrb.mxu1 %v2031_v19 }
  0x56   :  { %607 = vmatpush.msrb.mxu3 %v1999_v15 }
  0x57   :  { %449 = vmatpush.msrb.mxu0 %v2015_v17  ;;  %482 = vmatpush.msrb.mxu1 %v2039_v20 }
  0x58   :  { %608 = vmatpush.msrb.mxu3 %v2007_v16 }
  0x59   :  { %450 = vmatpush.msrb.mxu0 %v2023_v18  ;;  %483 = vmatpush.msrb.mxu1 %v2047_v21 }
  0x5a   :  { %609 = vmatpush.msrb.mxu3 %v2015_v17 }
  0x5b   :  { %451 = vmatpush.msrb.mxu0 %v2031_v19  ;;  %484 = vmatpush.msrb.mxu1 %v2055_v22 }
  0x5c   :  { %610 = vmatpush.msrb.mxu3 %v2023_v18 }
  0x5d   :  { %452 = vmatpush.msrb.mxu0 %v2039_v20  ;;  %485 = vmatpush.msrb.mxu1 %v2066_v24 }
  0x5e   :  { %611 = vmatpush.msrb.mxu3 %v2031_v19 }
  0x5f   :  { %453 = vmatpush.msrb.mxu0 %v2047_v21  ;;  %486 = vmatpush.msrb.mxu1 %v2074_v26 }
  0x60   :  { %612 = vmatpush.msrb.mxu3 %v2039_v20 }
  0x61   :  { %454 = vmatpush.msrb.mxu0 %v2055_v22  ;;  %487 = vmatpush.msrb.mxu1 %v2082_v28 }
  0x62   :  { %613 = vmatpush.msrb.mxu3 %v2047_v21 }
  0x63   :  { %455 = vmatpush.msrb.mxu0 %v2066_v24 }
  0x64   :  { %614 = vmatpush.msrb.mxu3 %v2055_v22 }
  0x65   :  { %456 = vmatpush.msrb.mxu0 %v2074_v26 }
  0x66   :  { %615 = vmatpush.msrb.mxu3 %v2066_v24 }
  0x67   :  { %457 = vmatpush.msrb.mxu0 %v2082_v28 }
  0x68   :  { %616 = vmatpush.msrb.mxu3 %v2074_v26 }
  0x69   :  { %632 = vmatpush.msra.mxu0 %v1963_v10 }
  0x6a   :  { %617 = vmatpush.msrb.mxu3 %v2082_v28 }
  0x6b   :  { %633 = vmatpush.msra.mxu0 %v1970_v11 }
  0x6d   :  { %634 = vmatpush.msra.mxu0 %v1978_v12 }
  0x6f   :  { %635 = vmatpush.msra.mxu0 %v1986_v13 }
  0x71   :  { %636 = vmatpush.msra.mxu0 %v1993_v14 }
  0x73   :  { %637 = vmatpush.msra.mxu0 %v1999_v15 }
  0x75   :  { %638 = vmatpush.msra.mxu0 %v2007_v16 }
  0x77   :  { %639 = vmatpush.msra.mxu0 %v2015_v17 }
  0x79   :  { %640 = vmatpush.msra.mxu0 %v2023_v18 }
  0x7b   :  { %641 = vmatpush.msra.mxu0 %v2031_v19  ;;  %v1594_v19 = vld [vmem:[%s2265_s7] ss:$0 sm:$0xff] }
  0x7d   :  { %642 = vmatpush.msra.mxu0 %v2039_v20 }
  0x7f   :  { %643 = vmatpush.msra.mxu0 %v2047_v21 }
  0x81   :  { %644 = vmatpush.msra.mxu0 %v2055_v22 }
  0x83   :  { %645 = vmatpush.msra.mxu0 %v2066_v24 }
  0x85   :  { %646 = vmatpush.msra.mxu0 %v2074_v26 }
  0x87   :  { %647 = vmatpush.msra.mxu0 %v2082_v28 }
  0xc5   :  { %v255_v25 = vpop.f32.mrf.mxu0 }
  0xc6   :  { %v256_v27 = vadd.f32 %v1593_v23, %v255_v25 }
  0xc8   :  { %v260_v29 = vmul.f32 0.044715, %v256_v27  ;;  %v259_v39 = vmul.f32 0.5, %v256_v27 }
  0xca   :  { %v261_v30 = vmul.f32 %v260_v29, %v256_v27 }
  0xcc   :  { %v262_v31 = vmul.f32 %v261_v30, %v256_v27 }
  0xcd   :  { %v257_v32 = vpop.f32.mrf.mxu0 }
  0xce   :  { %v263_v34 = vadd.f32 %v262_v31, %v256_v27 }
  0xd0   :  { %v264_v35 = vmul.f32 0.7978846, %v263_v34 }
  0xd2   :  { %1603 = vtanh.f32 %v264_v35 }
  0xd8   :  { %v1604_v38 = vpop.eup %1603 }
  0xd9   :  { %v266_v40 = vadd.f32 1.0, %v1604_v38 }
  0xdb   :  { %v267_v42 = vmul.f32 %v266_v40, %v259_v39  ;;  %v1533_v40 = vld [vmem:[%s2266_s9 + $0x38] sm:$0xff] }
  0xdc   :  { %573 = vmatpush.bf16.msrb.mxu2 %v1533_v40  ;;  %v1540_v40 = vld [vmem:[#allocation2 + $0x30] sm:$0xff] }
  0xdd   :  { %v268_v43 = vrot.slane %v267_v42, 4 }
  0xdf   :  { %v269_v45 = vadd.f32 %v268_v43, %v267_v42 }
  0xe0   :  { %574 = vmatpush.bf16.msrb.mxu2 %v1532_v53 }
  0xe1   :  { %v270_v46 = vrot.slane %v269_v45, 2 }
  0xe3   :  { %v271_v48 = vadd.f32 %v270_v46, %v269_v45 }
  0xe5   :  { %v272_v49 = vrot.slane %v271_v48, 1 }
  0xe7   :  { %v273_v51 = vadd.f32 %v272_v49, %v271_v48 }
  0xe9   :  { %v281_v52 = vmul.f32 %v2118_v50, %v273_v51 }
  0xeb   :  { %298 = vmatmul.f32.vlgmr.msra.gmra.mxu1 %v281_v52 }
 0x168   :  { %v299_v54 = vpop.f32.mrf.mxu1 }
 0x169   :  { %v302_v55 = vperm.slane %v299_v54, 0  ;;  %v1531_v54 = vld [vmem:[%s2266_s9 + $0x28] sm:$0xff] }
 0x16a   :  { %575 = vmatpush.bf16.msrb.mxu2 %v1531_v54 }
 0x16b   :  { %v303_v56 = vsub.f32 %v267_v42, %v302_v55  ;;  %v1530_v55 = vld [vmem:[%s2266_s9 + $0x20] sm:$0xff] }
 0x16d   :  { %v304_v57 = vmul.f32 %v303_v56, %v303_v56 }
 0x16e   :  { %576 = vmatpush.bf16.msrb.mxu2 %v1530_v55 }
 0x16f   :  { %v305_v58 = vrot.slane %v304_v57, 4 }
 0x171   :  { %v306_v59 = vadd.f32 %v305_v58, %v304_v57  ;;  %v1528_v57 = vld [vmem:[%s2266_s9 + $0x10] sm:$0xff]  ;;  %v1527_v58 = vld [vmem:[%s2266_s9 + $0x8] sm:$0xff] }
 0x173   :  { %v307_v60 = vrot.slane %v306_v59, 2 }
 0x175   :  { %v308_v61 = vadd.f32 %v307_v60, %v306_v59  ;;  %v1526_v59 = vld [vmem:[%s2266_s9] sm:$0xff] }
 0x177   :  { %v309_v62 = vrot.slane %v308_v61, 1 }
 0x179   :  { %v310_v63 = vadd.f32 %v309_v62, %v308_v61 }
 0x17b   :  { %v311_v0 = vmul.f32 %v310_v63, %v2118_v50 }
 0x17d   :  { %328 = vmatmul.f32.vlgmr.msra.gmra.mxu2 %v311_v0 }
 0x200   :  { %v329_v8 = vpop.f32.mrf.mxu2 }
 0x201   :  { %v330_v9 = vadd.f32 1e-05, %v329_v8  ;;  %v1595_v8 = vld [vmem:[%s2267_s30] ss:$0 sm:$0xff] }
 0x203   :  { %1605 = vrsqrt.f32 %v330_v9  ;;  %vm338_vm2 = vweird.f32 %v330_v9 }
 0x209   :  { %v1606_v23 = vpop.eup %1605 }
 0x20a   :  { %v333_v10 = vmul.f32 %v1606_v23, %v330_v9  ;;  %vm339_vm1 = vweird.f32 %v1606_v23 }
 0x20b   :  { %vm340_vm3 = vmor %vm338_vm2, %vm339_vm1 }
 0x20c   :  { %v334_v11 = vmul.f32 %v1606_v23, %v333_v10 }
 0x20e   :  { %v335_v12 = vmul.f32 0.5, %v334_v11 }
 0x210   :  { %v336_v13 = vsub.f32 1.5, %v335_v12 }
 0x212   :  { %v337_v14 = vmul.f32 %v1606_v23, %v336_v13 }
 0x214   :  { %v341_v15 = vsel %vm340_vm3, %v1606_v23, %v337_v14 }
 0x215   :  { %v342_v16 = vperm.slane %v341_v15, 0 }
 0x217   :  { %v343_v17 = vmul.f32 %v342_v16, %v303_v56  ;;  %v1529_v56 = vld [vmem:[%s2266_s9 + $0x18] sm:$0xff] }
 0x218   :  { %577 = vmatpush.bf16.msrb.mxu2 %v1529_v56 }
 0x219   :  { %v344_v18 = vpack.c.bf16 %v343_v17, %v343_v17 }
 0x21b   :  { %421 = vmatmul.bf16.vlgmr.msra.gmra.mxu3 %v344_v18 }
 0x21c   :  { %578 = vmatpush.bf16.msrb.mxu2 %v1528_v57 }
 0x220   :  { %579 = vmatpush.bf16.msrb.mxu2 %v1527_v58 }
 0x224   :  { %580 = vmatpush.bf16.msrb.mxu2 %v1526_v59 }
 0x29e   :  { %v422_v20 = vpop.f32.mrf.mxu3 }
 0x29f   :  { %v423_v21 = vadd.f32 %v1594_v19, %v422_v20 }
 0x2a1   :  { %v427_v22 = vmul.f32 0.044715, %v423_v21  ;;  %v426_v26 = vmul.f32 0.5, %v423_v21 }
 0x2a3   :  { %v428_v25 = vmul.f32 %v427_v22, %v423_v21 }
 0x2a5   :  { %v429_v27 = vmul.f32 %v428_v25, %v423_v21 }
 0x2a6   :  { %v424_v29 = vpop.f32.mrf.mxu3 }
 0x2a7   :  { %v430_v24 = vadd.f32 %v429_v27, %v423_v21 }
 0x2a9   :  { %v431_v30 = vmul.f32 0.7978846, %v430_v24 }
 0x2ab   :  { %1607 = vtanh.f32 %v431_v30  ;;  %v1541_v30 = vld [vmem:[#allocation2 + $0x38] sm:$0xff] }
 0x2ac   :  { %733 = vmatpush.bf16.msra.mxu1 %v1541_v30 }
 0x2b0   :  { %734 = vmatpush.bf16.msra.mxu1 %v1540_v40 }
 0x2b1   :  { %v1608_v31 = vpop.eup %1607 }
 0x2b2   :  { %v433_v32 = vadd.f32 1.0, %v1608_v31 }
 0x2b4   :  { %v434_v33 = vmul.f32 %v433_v32, %v426_v26 }
 0x2b6   :  { %v435_v28 = vrot.slane %v434_v33, 4 }
 0x2b8   :  { %v436_v34 = vadd.f32 %v435_v28, %v434_v33 }
 0x2ba   :  { %v437_v35 = vrot.slane %v436_v34, 2 }
 0x2bc   :  { %v438_v36 = vadd.f32 %v437_v35, %v436_v34 }
 0x2be   :  { %v439_v37 = vrot.slane %v438_v36, 1 }
 0x2c0   :  { %v440_v38 = vadd.f32 %v439_v37, %v438_v36 }
 0x2c2   :  { %v441_v39 = vmul.f32 %v440_v38, %v2118_v50 }
 0x2c4   :  { %458 = vmatmul.f32.vlgmr.msrb.gmra.mxu0 %v441_v39 }
 0x341   :  { %v459_v41 = vpop.f32.mrf.mxu0 }
 0x342   :  { %v462_v42 = vperm.slane %v459_v41, 0  ;;  %v1539_v41 = vld [vmem:[#allocation2 + $0x28] sm:$0xff] }
 0x343   :  { %735 = vmatpush.bf16.msra.mxu1 %v1539_v41  ;;  %v1565_v41 = vld [vmem:[#allocation7 + $0x38] sm:$0xff] }
 0x344   :  { %v463_v43 = vsub.f32 %v434_v33, %v462_v42  ;;  %v1538_v42 = vld [vmem:[#allocation2 + $0x20] sm:$0xff]  ;;  %1011 = vmatpush.bf16.msrb.mxu0 %v1565_v41 }
 0x346   :  { %v464_v44 = vmul.f32 %v463_v43, %v463_v43 }
 0x347   :  { %736 = vmatpush.bf16.msra.mxu1 %v1538_v42  ;;  %v1564_v42 = vld [vmem:[#allocation7 + $0x30] sm:$0xff] }
 0x348   :  { %v465_v45 = vrot.slane %v464_v44, 4  ;;  %1012 = vmatpush.bf16.msrb.mxu0 %v1564_v42 }
 0x34a   :  { %v466_v46 = vadd.f32 %v465_v45, %v464_v44  ;;  %v1536_v44 = vld [vmem:[#allocation2 + $0x10] sm:$0xff]  ;;  %v1535_v45 = vld [vmem:[#allocation2 + $0x8] sm:$0xff] }
 0x34c   :  { %v467_v47 = vrot.slane %v466_v46, 2 }
 0x34e   :  { %v468_v48 = vadd.f32 %v467_v47, %v466_v46  ;;  %v1534_v46 = vld [vmem:[#allocation2] sm:$0xff]  ;;  %v1549_v47 = vld [vmem:[#allocation4 + $0x38] sm:$0xff] }
 0x34f   :  { %824 = vmatpush.bf16.msra.mxu2 %v1549_v47  ;;  %v1559_v47 = vld [vmem:[#allocation7 + $0x8] sm:$0xff] }
 0x350   :  { %v469_v49 = vrot.slane %v468_v48, 1 }
 0x352   :  { %v470_v51 = vadd.f32 %v469_v49, %v468_v48  ;;  %v1548_v48 = vld [vmem:[#allocation4 + $0x30] sm:$0xff] }
 0x353   :  { %825 = vmatpush.bf16.msra.mxu2 %v1548_v48 }
 0x354   :  { %v471_v52 = vmul.f32 %v470_v51, %v2118_v50 }
 0x356   :  { %488 = vmatmul.f32.vlgmr.msrb.gmra.mxu1 %v471_v52 }
 0x3d3   :  { %v489_v60 = vpop.f32.mrf.mxu1 }
 0x3d4   :  { %v490_v61 = vadd.f32 1e-05, %v489_v60 }
 0x3d6   :  { %1609 = vrsqrt.f32 %v490_v61  ;;  %vm498_vm5 = vweird.f32 %v490_v61 }
 0x3dc   :  { %v1610_v62 = vpop.eup %1609 }
 0x3dd   :  { %v493_v63 = vmul.f32 %v1610_v62, %v490_v61  ;;  %vm499_vm4 = vweird.f32 %v1610_v62  ;;  %v1547_v61 = vld [vmem:[#allocation4 + $0x28] sm:$0xff] }
 0x3de   :  { %vm500_vm6 = vmor %vm498_vm5, %vm499_vm4  ;;  %826 = vmatpush.bf16.msra.mxu2 %v1547_v61 }
 0x3df   :  { %v494_v0 = vmul.f32 %v1610_v62, %v493_v63  ;;  %v1545_v63 = vld [vmem:[#allocation4 + $0x18] sm:$0xff] }
 0x3e1   :  { %v495_v1 = vmul.f32 0.5, %v494_v0  ;;  %v1544_v0 = vld [vmem:[#allocation4 + $0x10] sm:$0xff] }
 0x3e3   :  { %v496_v2 = vsub.f32 1.5, %v495_v1  ;;  %v1543_v1 = vld [vmem:[#allocation4 + $0x8] sm:$0xff] }
 0x3e5   :  { %v497_v3 = vmul.f32 %v1610_v62, %v496_v2  ;;  %v1542_v2 = vld [vmem:[#allocation4] sm:$0xff] }
 0x3e7   :  { %v501_v4 = vsel %vm500_vm6, %v1610_v62, %v497_v3  ;;  %v1546_v62 = vld [vmem:[#allocation4 + $0x20] sm:$0xff]  ;;  %v1557_v3 = vld [vmem:[#allocation6 + $0x38] sm:$0xff] }
 0x3e8   :  { %v502_v5 = vperm.slane %v501_v4, 0  ;;  %827 = vmatpush.bf16.msra.mxu2 %v1546_v62  ;;  %903 = vmatpush.bf16.msra.mxu3 %v1557_v3  ;;  %v1556_v4 = vld [vmem:[#allocation6 + $0x30] sm:$0xff]  ;;  %v1781_v3 = vmov 1.0|1.0  }
 0x3ea   :  { %v503_v6 = vmul.f32 %v502_v5, %v463_v43  ;;  %v1537_v43 = vld [vmem:[#allocation2 + $0x18] sm:$0xff]  ;;  %v1596_v5 = vld [vmem:[%s2236_s8] ss:$0 sm:$0xff] }
 0x3eb   :  { %737 = vmatpush.bf16.msra.mxu1 %v1537_v43  ;;  %v1563_v43 = vld [vmem:[#allocation7 + $0x28] sm:$0xff] }
 0x3ec   :  { %v504_v7 = vpack.c.bf16 %v503_v6, %v503_v6  ;;  %828 = vmatpush.bf16.msra.mxu2 %v1545_v63  ;;  %904 = vmatpush.bf16.msra.mxu3 %v1556_v4  ;;  %v1566_v4 = vld [vmem:[#allocation9] sm:$0xff] }
 0x3ed   :  { %1013 = vmatpush.bf16.msrb.mxu0 %v1563_v43 }
 0x3ee   :  { %581 = vmatmul.bf16.vlgmr.msrb.gmra.mxu2 %v504_v7  ;;  %v1555_v7 = vld [vmem:[#allocation6 + $0x28] sm:$0xff] }
 0x3ef   :  { %738 = vmatpush.bf16.msra.mxu1 %v1536_v44  ;;  %v1562_v44 = vld [vmem:[#allocation7 + $0x20] sm:$0xff] }
 0x3f0   :  { %829 = vmatpush.bf16.msra.mxu2 %v1544_v0  ;;  %905 = vmatpush.bf16.msra.mxu3 %v1555_v7 }
 0x3f1   :  { %1014 = vmatpush.bf16.msrb.mxu0 %v1562_v44 }
 0x3f3   :  { %739 = vmatpush.bf16.msra.mxu1 %v1535_v45  ;;  %v1561_v45 = vld [vmem:[#allocation7 + $0x18] sm:$0xff] }
 0x3f4   :  { %830 = vmatpush.bf16.msra.mxu2 %v1543_v1  ;;  %v1780_v1 = vmov 0.0  }
 0x3f5   :  { %1015 = vmatpush.bf16.msrb.mxu0 %v1561_v45 }
 0x3f7   :  { %740 = vmatpush.bf16.msra.mxu1 %v1534_v46  ;;  %v1560_v46 = vld [vmem:[#allocation7 + $0x10] sm:$0xff] }
 0x3f8   :  { %831 = vmatpush.bf16.msra.mxu2 %v1542_v2 }
 0x3f9   :  { %1016 = vmatpush.bf16.msrb.mxu0 %v1560_v46 }
 0x3fd   :  { %1017 = vmatpush.bf16.msrb.mxu0 %v1559_v47 }
 0x471   :  { %v582_v9 = vpop.f32.mrf.mxu2 }
 0x472   :  { %v583_v23 = vadd.f32 %v1595_v8, %v582_v9 }
 0x474   :  { %v587_v10 = vmul.f32 0.044715, %v583_v23  ;;  %v586_v17 = vmul.f32 0.5, %v583_v23 }
 0x476   :  { %v588_v11 = vmul.f32 %v587_v10, %v583_v23 }
 0x478   :  { %v589_v12 = vmul.f32 %v588_v11, %v583_v23 }
 0x479   :  { %v584_v13 = vpop.f32.mrf.mxu2 }
 0x47a   :  { %v590_v14 = vadd.f32 %v589_v12, %v583_v23  ;;  %v1554_v23 = vld [vmem:[#allocation6 + $0x20] sm:$0xff]  ;;  %v1553_v13 = vld [vmem:[#allocation6 + $0x18] sm:$0xff] }
 0x47b   :  { %906 = vmatpush.bf16.msra.mxu3 %v1554_v23  ;;  %v1579_v23 = vld [vmem:[#allocation10 + $0x28] sm:$0xff] }
 0x47c   :  { %v591_v15 = vmul.f32 0.7978846, %v590_v14 }
 0x47e   :  { %1611 = vtanh.f32 %v591_v15 }
 0x47f   :  { %907 = vmatpush.bf16.msra.mxu3 %v1553_v13  ;;  %v1575_v13 = vld [vmem:[#allocation10 + $0x8] sm:$0xff] }
 0x484   :  { %v1612_v16 = vpop.eup %1611 }
 0x485   :  { %v593_v18 = vadd.f32 1.0, %v1612_v16  ;;  %v1552_v16 = vld [vmem:[#allocation6 + $0x10] sm:$0xff] }
 0x486   :  { %908 = vmatpush.bf16.msra.mxu3 %v1552_v16 }
 0x487   :  { %v594_v19 = vmul.f32 %v593_v18, %v586_v17  ;;  %v1551_v17 = vld [vmem:[#allocation6 + $0x8] sm:$0xff] }
 0x489   :  { %v595_v20 = vrot.slane %v594_v19, 4 }
 0x48a   :  { %909 = vmatpush.bf16.msra.mxu3 %v1551_v17 }
 0x48b   :  { %v596_v21 = vadd.f32 %v595_v20, %v594_v19 }
 0x48d   :  { %v597_v22 = vrot.slane %v596_v21, 2 }
 0x48f   :  { %v598_v25 = vadd.f32 %v597_v22, %v596_v21 }
 0x491   :  { %v599_v27 = vrot.slane %v598_v25, 1 }
 0x493   :  { %v600_v29 = vadd.f32 %v599_v27, %v598_v25  ;;  %v1550_v25 = vld [vmem:[#allocation6] sm:$0xff] }
 0x494   :  { %910 = vmatpush.bf16.msra.mxu3 %v1550_v25  ;;  %v1597_v27 = vld [vmem:[%s2239_s11] ss:$0 sm:$0xff] }
 0x495   :  { %v601_v24 = vmul.f32 %v600_v29, %v2118_v50 }
 0x497   :  { %618 = vmatmul.f32.vlgmr.msrb.gmra.mxu3 %v601_v24 }
 0x51a   :  { %v619_v31 = vpop.f32.mrf.mxu3 }
 0x51b   :  { %v622_v26 = vperm.slane %v619_v31, 0 }
 0x51d   :  { %v623_v32 = vsub.f32 %v594_v19, %v622_v26  ;;  %v1598_v26 = vld [vmem:[%s2242_s14] ss:$0 sm:$0xff] }
 0x51f   :  { %v624_v33 = vmul.f32 %v623_v32, %v623_v32 }
 0x521   :  { %v625_v28 = vrot.slane %v624_v33, 4 }
 0x523   :  { %v626_v34 = vadd.f32 %v625_v28, %v624_v33 }
 0x525   :  { %v627_v35 = vrot.slane %v626_v34, 2 }
 0x527   :  { %v628_v36 = vadd.f32 %v627_v35, %v626_v34  ;;  %v924_v35 = vlaneseq }
 0x529   :  { %v629_v37 = vrot.slane %v628_v36, 1 }
 0x52b   :  { %v630_v38 = vadd.f32 %v629_v37, %v628_v36  ;;  %v925_v36 = vand.u32 127, %v924_v35 }
 0x52d   :  { %v631_v39 = vmul.f32 %v630_v38, %v2118_v50 }
 0x52f   :  { %648 = vmatmul.f32.vlgmr.msra.gmra.mxu0 %v631_v39 }
 0x5ac   :  { %v649_v49 = vpop.f32.mrf.mxu0 }
 0x5ad   :  { %v650_v50 = vadd.f32 1e-05, %v649_v49 }
 0x5af   :  { %1613 = vrsqrt.f32 %v650_v50  ;;  %vm658_vm8 = vweird.f32 %v650_v50 }
 0x5b5   :  { %v1614_v51 = vpop.eup %1613 }
 0x5b6   :  { %v653_v52 = vmul.f32 %v1614_v51, %v650_v50  ;;  %vm659_vm7 = vweird.f32 %v1614_v51 }
 0x5b7   :  { %vm660_vm9 = vmor %vm658_vm8, %vm659_vm7 }
 0x5b8   :  { %v654_v53 = vmul.f32 %v1614_v51, %v653_v52  ;;  %v1558_v52 = vld [vmem:[#allocation7] sm:$0xff] }
 0x5b9   :  { %1018 = vmatpush.bf16.msrb.mxu0 %v1558_v52 }
 0x5ba   :  { %v655_v54 = vmul.f32 0.5, %v654_v53  ;;  %v1573_v53 = vld [vmem:[#allocation9 + $0x38] sm:$0xff] }
 0x5bb   :  { %1094 = vmatpush.bf16.msrb.mxu1 %v1573_v53 }
 0x5bc   :  { %v656_v55 = vsub.f32 1.5, %v655_v54  ;;  %v1572_v54 = vld [vmem:[#allocation9 + $0x30] sm:$0xff] }
 0x5be   :  { %v657_v56 = vmul.f32 %v1614_v51, %v656_v55  ;;  %v1571_v55 = vld [vmem:[#allocation9 + $0x28] sm:$0xff] }
 0x5bf   :  { %1095 = vmatpush.bf16.msrb.mxu1 %v1572_v54 }
 0x5c0   :  { %v661_v57 = vsel %vm660_vm9, %v1614_v51, %v657_v56  ;;  %v1570_v56 = vld [vmem:[#allocation9 + $0x20] sm:$0xff] }
 0x5c1   :  { %v662_v58 = vperm.slane %v661_v57, 0  ;;  %v1569_v57 = vld [vmem:[#allocation9 + $0x18] sm:$0xff] }
 0x5c3   :  { %v663_v59 = vmul.f32 %v662_v58, %v623_v32  ;;  %1096 = vmatpush.bf16.msrb.mxu1 %v1571_v55  ;;  %v1568_v58 = vld [vmem:[#allocation9 + $0x10] sm:$0xff] }
 0x5c5   :  { %v664_v60 = vpack.c.bf16 %v663_v59, %v663_v59 }
 0x5c7   :  { %741 = vmatmul.bf16.vlgmr.msra.gmra.mxu1 %v664_v60  ;;  %v1567_v60 = vld [vmem:[#allocation9 + $0x8] sm:$0xff] }
 0x5c8   :  { %1097 = vmatpush.bf16.msrb.mxu1 %v1570_v56 }
 0x5cc   :  { %1098 = vmatpush.bf16.msrb.mxu1 %v1569_v57 }
 0x5d0   :  { %1099 = vmatpush.bf16.msrb.mxu1 %v1568_v58 }
 0x5d4   :  { %1100 = vmatpush.bf16.msrb.mxu1 %v1567_v60 }
 0x5d8   :  { %1101 = vmatpush.bf16.msrb.mxu1 %v1566_v4 }
 0x644   :  { %v742_v6 = vpop.f32.mrf.mxu1 }
 0x645   :  { %v743_v8 = vadd.f32 %v1596_v5, %v742_v6  ;;  %v1581_v5 = vld [vmem:[#allocation10 + $0x38] sm:$0xff]  ;;  %v1580_v6 = vld [vmem:[#allocation10 + $0x30] sm:$0xff] }
 0x646   :  { %1185 = vmatpush.bf16.msrb.mxu2 %v1581_v5 }
 0x647   :  { %v747_v9 = vmul.f32 0.044715, %v743_v8  ;;  %v746_v19 = vmul.f32 0.5, %v743_v8 }
 0x649   :  { %v748_v10 = vmul.f32 %v747_v9, %v743_v8 }
 0x64a   :  { %1186 = vmatpush.bf16.msrb.mxu2 %v1580_v6 }
 0x64b   :  { %v749_v11 = vmul.f32 %v748_v10, %v743_v8  ;;  %v1578_v10 = vld [vmem:[#allocation10 + $0x20] sm:$0xff] }
 0x64c   :  { %v744_v12 = vpop.f32.mrf.mxu1 }
 0x64d   :  { %v750_v14 = vadd.f32 %v749_v11, %v743_v8  ;;  %v1577_v11 = vld [vmem:[#allocation10 + $0x18] sm:$0xff]  ;;  %v1576_v12 = vld [vmem:[#allocation10 + $0x10] sm:$0xff] }
 0x64e   :  { %1187 = vmatpush.bf16.msrb.mxu2 %v1579_v23 }
 0x64f   :  { %v751_v15 = vmul.f32 0.7978846, %v750_v14  ;;  %v1574_v14 = vld [vmem:[#allocation10] sm:$0xff] }
 0x651   :  { %1615 = vtanh.f32 %v751_v15  ;;  %v1599_v15 = vld [vmem:[%s2244_s16] ss:$0 sm:$0xff] }
 0x652   :  { %1188 = vmatpush.bf16.msrb.mxu2 %v1578_v10 }
 0x656   :  { %1189 = vmatpush.bf16.msrb.mxu2 %v1577_v11 }
 0x657   :  { %v1616_v18 = vpop.eup %1615 }
 0x658   :  { %v753_v20 = vadd.f32 1.0, %v1616_v18 }
 0x65a   :  { %v754_v21 = vmul.f32 %v753_v20, %v746_v19  ;;  %1190 = vmatpush.bf16.msrb.mxu2 %v1576_v12 }
 0x65c   :  { %v755_v22 = vpack.c.bf16 %v754_v21, %v754_v21 }
 0x65e   :  { %832 = vmatmul.bf16.vlgmr.msra.gmra.mxu2 %v755_v22 }
 0x65f   :  { %1191 = vmatpush.bf16.msrb.mxu2 %v1575_v13 }
 0x663   :  { %1192 = vmatpush.bf16.msrb.mxu2 %v1574_v14 }
 0x6e1   :  { %v833_v29 = vpop.f32.mrf.mxu2 }
 0x6e2   :  { %v834_v24 = vadd.f32 %v1597_v27, %v833_v29 }
 0x6e4   :  { %837 = vst [vmem:[%s2247_s19] sm:$0xff] %v834_v24  ;;  %v838_v30 = vpack.c.bf16 %v834_v24, %v834_v24 }
 0x6e6   :  { %911 = vmatmul.bf16.vlgmr.msra.gmra.mxu3 %v838_v30 }
 0x6e9   :  { %v835_v31 = vpop.f32.mrf.mxu2 }
 0x769   :  { %v912_v32 = vpop.f32.mrf.mxu3 }
 0x76a   :  { %v917_v33 = vmul.f32 2.0, %v912_v32 }
 0x76c   :  { %v921_v28 = vsub.f32 %v1598_v26, %v917_v33  ;;  %v1600_v26 = vld [vmem:[%s2246_s18] ss:$0 sm:$0xff] }
 0x76e   :  { %922 = vmin.xlane.f32.xlu0 %v921_v28 }
 0x771   :  { %v914_v34 = vpop.f32.mrf.mxu3 }
 0x7e1   :  { %v923_v37 = vpop.xlane.xlu0 %922 }
 0x7e2   :  { %vm926_vm10 = vcmp.le.f32.partialorder %v921_v28, %v923_v37 }
 0x7e3   :  { %v927_v38 = vsel %vm926_vm10, %v925_v36, 128 }
 0x7e4   :  { %v929_v39 = vshra.s32 %v927_v38, 16  ;;  %v928_v48 = vand.u32 65535, %v927_v38 }
 0x7e6   :  { %v931_v40 = vcvt.s32.f32 %v929_v39  ;;  %v930_v50 = vcvt.s32.f32 %v928_v48 }
 0x7e8   :  { %932 = vmin.xlane.f32.xlu0 %v931_v40 }
 0x85b   :  { %v933_v49 = vpop.xlane.xlu0 %932 }
 0x85c   :  { %vm934_vm11 = vcmp.eq.f32.partialorder %v931_v40, %v933_v49  ;;  %v939_v59 = vcvt.f32.s32 %v933_v49 }
 0x85d   :  { %v935_v51 = vsel %vm934_vm11, %v930_v50, inf }
 0x85e   :  { %936 = vmin.xlane.f32.xlu1 %v935_v51  ;;  %v940_v62 = vshll.u32 %v939_v59, 16 }
 0x8d1   :  { %v937_v61 = vpop.xlane.xlu1 %936 }
 0x8d2   :  { %v938_v63 = vcvt.f32.s32 %v937_v61 }
 0x8d4   :  { %v941_v0 = vadd.s32 %v940_v62, %v938_v63 }
 0x8d6   :  { %vm942_vm12 = vcmp.eq.s32.totalorder %v925_v36, %v941_v0 }
 0x8d7   :  { %v1411_v2 = vsel %vm942_vm12, 1.0, %v1780_v1  ;;  %vm1444_vm13 = vmpackc.low %vm942_vm12, %vm942_vm12 }
 0x8d8   :  { %945 = vst [vmem:[%s2249_s21] sm:$0xff] %v1411_v2  ;;  %1445 = vmatmul.msk.bf16.vlgmr.msrb.gmra.mxu0 %vm1444_vm13, %v1781_v3 }
 0x955   :  { %v1020_v7 = vpop.f32.mrf.mxu0 }
 0x956   :  { %1024 = vst [vmem:[%s2248_s20] sm:$0xff] %v1020_v7  ;;  %v1025_v8 = vpack.c.bf16 %v1020_v7, %v1020_v7 }
 0x958   :  { %1102 = vmatmul.bf16.vlgmr.msrb.gmra.mxu1 %v1025_v8 }
 0x95d   :  { %v1022_v9 = vpop.f32.mrf.mxu0 }
 0x9d5   :  { %v1103_v16 = vpop.f32.mrf.mxu1 }
 0x9d6   :  { %v1104_v17 = vadd.f32 %v1599_v15, %v1103_v16 }
 0x9d8   :  { %v1108_v18 = vmul.f32 0.044715, %v1104_v17  ;;  %v1107_v29 = vmul.f32 0.5, %v1104_v17 }
 0x9da   :  { %v1109_v19 = vmul.f32 %v1108_v18, %v1104_v17 }
 0x9dc   :  { %v1110_v20 = vmul.f32 %v1109_v19, %v1104_v17 }
 0x9dd   :  { %v1105_v21 = vpop.f32.mrf.mxu1 }
 0x9de   :  { %v1111_v22 = vadd.f32 %v1110_v20, %v1104_v17 }
 0x9e0   :  { %v1112_v25 = vmul.f32 0.7978846, %v1111_v22 }
 0x9e2   :  { %1617 = vtanh.f32 %v1112_v25 }
 0x9e8   :  { %v1618_v27 = vpop.eup %1617 }
 0x9e9   :  { %v1114_v24 = vadd.f32 1.0, %v1618_v27 }
 0x9eb   :  { %v1115_v30 = vmul.f32 %v1114_v24, %v1107_v29 }
 0x9ed   :  { %v1116_v31 = vpack.c.bf16 %v1115_v30, %v1115_v30 }
 0x9ef   :  { %1193 = vmatmul.bf16.vlgmr.msrb.gmra.mxu2 %v1116_v31 }
 0xa72   :  { %v1194_v32 = vpop.f32.mrf.mxu2 }
 0xa73   :  { %v1195_v33 = vadd.f32 %v1600_v26, %v1194_v32 }
 0xa75   :  { %1198 = vst [vmem:[%s2250_s22] sm:$0xff] %v1195_v33 }
 0xa7a   :  { %v1196_v28 = vpop.f32.mrf.mxu2 }
 0xa7b   :  { %1215 = vsyncpa [#allocation3], 1 }
 0xa7c   :  { %1216 = vsyncpa [#allocation5], 1 }
 0xa7d   :  { %1217 = vsyncpa [#allocation8], 1 }
 0xa7e   :  { %1218 = vsyncpa [#allocation11], 1 }

</bundles_post_ra>
